<compile_context>
chip_gen: v7x
topology: tpu7x:2x2x1
jax: 0.10.0
libtpu: 0.0.40
codegen_flags: <defaults>
</compile_context>

<pallas_src>
import jax
import jax.numpy as jnp
from jax.experimental import pallas as pl
from jax.experimental.pallas import tpu as pltpu


SUBLANE = 8  # f32 sublane count; per-timestep rows padded to this stride


# ----------------------------------------------------------------------------
# Pallas kernel: single grid step, L timesteps unrolled inside.
# ----------------------------------------------------------------------------
def snac_lnet_kernel(x2d_ref, pos0_ref, h0_ref, c0_ref,
                     wxx_ref, wxp_ref, whh_ref, w1_ref, b_ref,
                     b1_ref, w2_ref, b2_ref, w3_ref, b3_ref,
                     pred_ref, hout_ref, cout_ref):
    B, L = pred_ref.shape
    H = h0_ref.shape[1]
    H2, H3, H4 = 2 * H, 3 * H, 4 * H
    step_rows = x2d_ref.shape[0] // L          # sublane-aligned row stride (8)

    # All-timestep x contribution to the gates in ONE MXU pass, with the
    # loop-invariant combined bias folded in once (pre-scaled host-side).
    xg = jnp.dot(x2d_ref[...], wxx_ref[...],
                 preferred_element_type=jnp.float32) + b_ref[...]   # (L*8, 4H)

    wxp = wxp_ref[...]        # (1, 4H)   pos -> gates row (VPU broadcast)
    whh = whh_ref[...]        # (H, 4H)   h   -> gates
    w1 = w1_ref[...]          # (H, 64)   MLP layer 1
    b1 = b1_ref[...]          # (1, 64)
    w2 = w2_ref[...]          # (64, 16)
    b2 = b2_ref[...]          # (1, 16)
    w3 = w3_ref[...]          # (1, 16)   last layer as a row (VPU reduce)
    b3 = b3_ref[...]          # (1, 1)

    h = h0_ref[...]           # (B, H)
    c = c0_ref[...]           # (B, H)
    pos = pos0_ref[...]       # (B, 1)    autoregressive position input

    # h contribution to the step-0 gates.
    hpart = jnp.dot(h, whh, preferred_element_type=jnp.float32)     # (B, 4H)

    for i in range(L):        # fully unrolled; L is static & small
        # 8-aligned sublane slice: whole-vreg read, no sublane shuffles.
        gates = xg[i * step_rows:i * step_rows + B, :] + pos * wxp + hpart

        # Single EUP pass over the (B, 4H) gate block.  The i/f/o columns of
        # every gate weight & bias were pre-scaled by 0.5 host-side, so
        # sigmoid(z) == 0.5 * tanh(0.5 * z) + 0.5 comes out of one tanh plus
        # one full-vreg VPU affine fixup; the g columns are left unscaled.
        t = jnp.tanh(gates)
        sig = t * 0.5 + 0.5
        i_g = sig[:, 0:H]
        f_g = sig[:, H:H2]
        g_g = t[:, H2:H3]
        o_g = sig[:, H3:H4]

        c = f_g * c + i_g * g_g
        h = o_g * jnp.tanh(c)

        # Issue the MLP-feeding matmul FIRST so its result drains from the
        # MXU result FIFO before the next-step gate partial (not needed until
        # after the pos path finishes).
        y1pre = jnp.dot(h, w1, preferred_element_type=jnp.float32)   # (B, 64)
        hpart = jnp.dot(h, whh, preferred_element_type=jnp.float32)  # (B, 4H)
        # TODO(synk): bf16 inputs for these two matmuls would cut MXU passes
        # but loosen autoregressive accuracy; kept f32 to preserve 1e-5 match.

        y1 = jnp.maximum(y1pre + b1, 0.0)                             # (B, 64)
        y2 = jnp.maximum(
            jnp.dot(y1, w2, preferred_element_type=jnp.float32) + b2, 0.0)  # (B, 16)
        # 16 -> 1 output layer on VPU/XLU (broadcast-mul + lane reduce) + ReLU.
        y = jnp.maximum(jnp.sum(y2 * w3, axis=-1, keepdims=True) + b3, 0.0)  # (B, 1)

        pred_ref[:, i:i + 1] = y        # VMEM-resident output; HBM write once
        pos = y

    hout_ref[...] = h
    cout_ref[...] = c


# ----------------------------------------------------------------------------
# Wrapper
# ----------------------------------------------------------------------------
def _full(shape):
    return pl.BlockSpec(shape, lambda i: (0, 0))


@jax.jit
def snac_lnet_forward(x_blk, pos, h0, c0, kparams):
    """x_blk: (B, L, K) batch-first, pos: (B, L, 1), h0/c0: (1, B, H).
    Returns (pred (B, L), h (1, B, H), c (1, B, H))."""
    B, L, K = x_blk.shape
    H = h0.shape[-1]
    rows = ((B + SUBLANE - 1) // SUBLANE) * SUBLANE

    # Time-major, sublane-padded observations: timestep i occupies rows
    # [i*rows, i*rows + B); padding rows are zero and never read.
    x_tm = jnp.transpose(x_blk, (1, 0, 2))                            # (L, B, K)
    x2d = jnp.zeros((L, rows, K), jnp.float32).at[:, :B, :].set(x_tm)
    x2d = x2d.reshape(L * rows, K)

    pos0 = pos[:, 0, :]                                               # (B, 1)
    h0_2d = h0[0]                                                     # (B, H)
    c0_2d = c0[0]                                                     # (B, H)

    (wxx, wxp, whh, b, w1, b1, w2, b2, w3_row, b3) = kparams

    grid_spec = pltpu.PrefetchScalarGridSpec(
        num_scalar_prefetch=0,
        grid=(1,),
        in_specs=[
            _full((L * rows, K)),         # x (time-major, sublane-padded)
            _full((B, 1)),                # pos0
            _full((B, H)),                # h0
            _full((B, H)),                # c0
            _full(wxx.shape), _full(wxp.shape), _full(whh.shape),
            _full(w1.shape), _full(b.shape), _full(b1.shape),
            _full(w2.shape), _full(b2.shape), _full(w3_row.shape),
            _full(b3.shape),
        ],
        out_specs=[
            _full((B, L)),                # predictions, write once
            _full((B, H)),                # final h
            _full((B, H)),                # final c
        ],
        scratch_shapes=[],
    )

    pred, h_fin, c_fin = pl.pallas_call(
        snac_lnet_kernel,
        grid_spec=grid_spec,
        out_shape=(
            jax.ShapeDtypeStruct((B, L), jnp.float32),
            jax.ShapeDtypeStruct((B, H), jnp.float32),
            jax.ShapeDtypeStruct((B, H), jnp.float32),
        ),
        compiler_params=pltpu.CompilerParams(
            dimension_semantics=("arbitrary",)),
    )(x2d, pos0, h0_2d, c0_2d, wxx, wxp, whh, w1, b, b1, w2, b2, w3_row, b3)

    # TODO(synk): for production batch sizes (esp. v7x's 2 TensorCores), add a
    # leading "parallel" grid axis over independent sequences / batch groups
    # to use the second core and amortize per-call dispatch; at B=2, L=8 that
    # would be pure overhead, so the single-shot layout is kept here.
    return pred, h_fin[None], c_fin[None]


# ----------------------------------------------------------------------------
# Parameters (shapes follow the PyTorch __init__; raw = PyTorch layout).
# ----------------------------------------------------------------------------
def make_params(key, input_size, hidden_size):
    """input_size = K + 1 (obs features + fed-back position)."""
    H = hidden_size
    ks = jax.random.split(key, 8)

    # LSTM weights (PyTorch layout: W_ih (4H, In), W_hh (4H, H)), uniform(-k, k)
    k_lstm = 1.0 / jnp.sqrt(H)
    w_ih = jax.random.uniform(ks[0], (4 * H, input_size), jnp.float32, -k_lstm, k_lstm)
    w_hh = jax.random.uniform(ks[1], (4 * H, H), jnp.float32, -k_lstm, k_lstm)
    b_ih = jax.random.uniform(ks[2], (4 * H,), jnp.float32, -k_lstm, k_lstm)
    b_hh = jax.random.uniform(ks[3], (4 * H,), jnp.float32, -k_lstm, k_lstm)

    wx = w_ih.T                                   # (In, 4H)
    wxx = wx[:-1, :]                              # (K, 4H)   obs -> gates
    wxp = wx[-1:, :]                              # (1, 4H)   pos -> gates
    whh = w_hh.T                                  # (H, 4H)
    b = (b_ih + b_hh)[None, :]                    # (1, 4H)

    # MLP (L2 branch): xavier_uniform with relu gain, zero bias.
    def xavier(k, din, dout):
        gain = jnp.sqrt(2.0)
        bound = gain * jnp.sqrt(6.0 / (din + dout))
        return jax.random.uniform(k, (din, dout), jnp.float32, -bound, bound)

    w1 = xavier(ks[4], H, 64)
    w2 = xavier(ks[5], 64, 16)
    w3 = xavier(ks[6], 16, 1)
    b1 = jnp.zeros((1, 64), jnp.float32)
    b2 = jnp.zeros((1, 16), jnp.float32)
    b3 = jnp.zeros((1, 1), jnp.float32)

    return (wxx, wxp, whh, b, w1, b1, w2, b2, w3, b3)


def prep_kernel_params(raw_params):
    """Host-side (zero runtime cost): pre-scale the i/f/o gate columns of the
    gate weights and bias by 0.5 so the kernel can evaluate sigmoid via
    0.5*tanh(0.5*z)+0.5 with a single tanh; g columns stay unscaled.  Also
    transpose the 16->1 layer into a row for the in-kernel lane reduce."""
    (wxx, wxp, whh, b, w1, b1, w2, b2, w3, b3) = raw_params
    H = whh.shape[0]
    scale = jnp.concatenate([
        jnp.full((2 * H,), 0.5, jnp.float32),     # i, f
        jnp.ones((H,), jnp.float32),              # g (tanh gate, unscaled)
        jnp.full((H,), 0.5, jnp.float32),         # o
    ])[None, :]
    return (wxx * scale, wxp * scale, whh * scale, b * scale,
            w1, b1, w2, b2, w3.T, b3)


# ----------------------------------------------------------------------------
# Pure-JAX reference (mirrors the PyTorch forward loop) for verification.
# ----------------------------------------------------------------------------
def reference_forward(x, pos, h0, c0, raw_params):
    (wxx, wxp, whh, b, w1, b1, w2, b2, w3, b3) = raw_params
    B, L, K = x.shape
    H = h0.shape[-1]
    h, c = h0[0], c0[0]
    input_pos = pos[:, 0, :]
    preds = []
    for i in range(L):
        x_t = x[:, i, :]
        gates = x_t @ wxx + input_pos @ wxp + h @ whh + b
        i_g = jax.nn.sigmoid(gates[:, 0:H])
        f_g = jax.nn.sigmoid(gates[:, H:2 * H])
        g_g = jnp.tanh(gates[:, 2 * H:3 * H])
        o_g = jax.nn.sigmoid(gates[:, 3 * H:4 * H])
        c = f_g * c + i_g * g_g
        h = o_g * jnp.tanh(c)
        y = jnp.maximum(h @ w1 + b1, 0.0)
        y = jnp.maximum(y @ w2 + b2, 0.0)
        y = jnp.maximum(y @ w3 + b3, 0.0)
        preds.append(y)
        input_pos = y
    return jnp.concatenate(preds, axis=1), h[None], c[None]


if __name__ == "__main__":
    B, L, K, H = 2, 8, 11, 32          # x: (B, L, 11), pos: (B, L, 1)
    input_size = K + 1                 # LSTM input = concat(obs, pos)

    key = jax.random.PRNGKey(0)
    k_x, k_p, k_w = jax.random.split(key, 3)
    x = jax.random.normal(k_x, (B, L, K), jnp.float32)
    pos = jax.random.normal(k_p, (B, L, 1), jnp.float32)
    h0 = jnp.zeros((1, B, H), jnp.float32)   # init_hidden_states
    c0 = jnp.zeros((1, B, H), jnp.float32)

    raw_params = make_params(k_w, input_size, H)
    kparams = prep_kernel_params(raw_params)

    pred, h_fin, c_fin = snac_lnet_forward(x, pos, h0, c0, kparams)
    jax.block_until_ready((pred, h_fin, c_fin))

    # Repack like the PyTorch forward: list of (B, 1, 1) predicted positions.
    predicted_pos = [pred[:, i][:, None, None] for i in range(L)]

    # Verify against the pure-JAX reference (uses the unscaled raw weights).
    pred_ref, h_ref, c_ref = reference_forward(x, pos, h0, c0, raw_params)
    assert jnp.allclose(pred, pred_ref, atol=1e-5), "prediction mismatch"
    assert jnp.allclose(h_fin, h_ref, atol=1e-5), "hidden state mismatch"
    assert jnp.allclose(c_fin, c_ref, atol=1e-5), "cell state mismatch"

    print("KERNEL_OK")
</pallas_src>

<mosaic_0001>
module attributes {stable_mosaic.version = 11 : i64} {
  func.func @snac_lnet_kernel(%arg0: i32, %arg1: memref<64x11xf32, #tpu.memory_space<vmem>>, %arg2: memref<2x1xf32, #tpu.memory_space<vmem>>, %arg3: memref<2x32xf32, #tpu.memory_space<vmem>>, %arg4: memref<2x32xf32, #tpu.memory_space<vmem>>, %arg5: memref<11x128xf32, #tpu.memory_space<vmem>>, %arg6: memref<1x128xf32, #tpu.memory_space<vmem>>, %arg7: memref<32x128xf32, #tpu.memory_space<vmem>>, %arg8: memref<32x64xf32, #tpu.memory_space<vmem>>, %arg9: memref<1x128xf32, #tpu.memory_space<vmem>>, %arg10: memref<1x64xf32, #tpu.memory_space<vmem>>, %arg11: memref<64x16xf32, #tpu.memory_space<vmem>>, %arg12: memref<1x16xf32, #tpu.memory_space<vmem>>, %arg13: memref<1x16xf32, #tpu.memory_space<vmem>>, %arg14: memref<1x1xf32, #tpu.memory_space<vmem>>, %arg15: memref<2x8xf32, #tpu.memory_space<vmem>>, %arg16: memref<2x32xf32, #tpu.memory_space<vmem>>, %arg17: memref<2x32xf32, #tpu.memory_space<vmem>>) attributes {dimension_semantics = [#tpu.dimension_semantics<arbitrary>], iteration_bounds = array<i64: 1>, scalar_prefetch = 0 : i64, scratch_operands = 0 : i64, tpu.core_type = #tpu.core_type<tc>, window_params = [{pipeline_mode = #tpu.pipeline_mode<synchronous>, transform_indices = @transform_0, window_bounds = array<i64: 64, 11>}, {pipeline_mode = #tpu.pipeline_mode<synchronous>, transform_indices = @transform_1, window_bounds = array<i64: 2, 1>}, {pipeline_mode = #tpu.pipeline_mode<synchronous>, transform_indices = @transform_2, window_bounds = array<i64: 2, 32>}, {pipeline_mode = #tpu.pipeline_mode<synchronous>, transform_indices = @transform_3, window_bounds = array<i64: 2, 32>}, {pipeline_mode = #tpu.pipeline_mode<synchronous>, transform_indices = @transform_4, window_bounds = array<i64: 11, 128>}, {pipeline_mode = #tpu.pipeline_mode<synchronous>, transform_indices = @transform_5, window_bounds = array<i64: 1, 128>}, {pipeline_mode = #tpu.pipeline_mode<synchronous>, transform_indices = @transform_6, window_bounds = array<i64: 32, 128>}, {pipeline_mode = #tpu.pipeline_mode<synchronous>, transform_indices = @transform_7, window_bounds = array<i64: 32, 64>}, {pipeline_mode = #tpu.pipeline_mode<synchronous>, transform_indices = @transform_8, window_bounds = array<i64: 1, 128>}, {pipeline_mode = #tpu.pipeline_mode<synchronous>, transform_indices = @transform_9, window_bounds = array<i64: 1, 64>}, {pipeline_mode = #tpu.pipeline_mode<synchronous>, transform_indices = @transform_10, window_bounds = array<i64: 64, 16>}, {pipeline_mode = #tpu.pipeline_mode<synchronous>, transform_indices = @transform_11, window_bounds = array<i64: 1, 16>}, {pipeline_mode = #tpu.pipeline_mode<synchronous>, transform_indices = @transform_12, window_bounds = array<i64: 1, 16>}, {pipeline_mode = #tpu.pipeline_mode<synchronous>, transform_indices = @transform_13, window_bounds = array<i64: 1, 1>}, {pipeline_mode = #tpu.pipeline_mode<synchronous>, transform_indices = @transform_14, window_bounds = array<i64: 2, 8>}, {pipeline_mode = #tpu.pipeline_mode<synchronous>, transform_indices = @transform_15, window_bounds = array<i64: 2, 32>}, {pipeline_mode = #tpu.pipeline_mode<synchronous>, transform_indices = @transform_16, window_bounds = array<i64: 2, 32>}]} {
    %c0 = arith.constant 0 : index
    %c0_0 = arith.constant 0 : index
    %0 = vector.load %arg1[%c0, %c0_0] : memref<64x11xf32, #tpu.memory_space<vmem>>, vector<64x11xf32>
    %c0_1 = arith.constant 0 : index
    %c0_2 = arith.constant 0 : index
    %1 = vector.load %arg5[%c0_1, %c0_2] : memref<11x128xf32, #tpu.memory_space<vmem>>, vector<11x128xf32>
    %cst = arith.constant dense<0.000000e+00> : vector<64x128xf32>
    %2 = tpu.matmul %0, %1, %cst {dimension_numbers = #tpu.dot_dimension_numbers<[1], [0], [0], [1], [0, 0, 1, 1], [], []>} : vector<64x11xf32>, vector<11x128xf32>, vector<64x128xf32> -> vector<64x128xf32>
    %c0_3 = arith.constant 0 : index
    %c0_4 = arith.constant 0 : index
    %3 = vector.load %arg9[%c0_3, %c0_4] : memref<1x128xf32, #tpu.memory_space<vmem>>, vector<1x128xf32>
    %4 = vector.broadcast %3 : vector<1x128xf32> to vector<64x128xf32>
    %5 = arith.addf %2, %4 : vector<64x128xf32>
    %c0_5 = arith.constant 0 : index
    %c0_6 = arith.constant 0 : index
    %6 = vector.load %arg6[%c0_5, %c0_6] : memref<1x128xf32, #tpu.memory_space<vmem>>, vector<1x128xf32>
    %c0_7 = arith.constant 0 : index
    %c0_8 = arith.constant 0 : index
    %7 = vector.load %arg7[%c0_7, %c0_8] : memref<32x128xf32, #tpu.memory_space<vmem>>, vector<32x128xf32>
    %c0_9 = arith.constant 0 : index
    %c0_10 = arith.constant 0 : index
    %8 = vector.load %arg8[%c0_9, %c0_10] : memref<32x64xf32, #tpu.memory_space<vmem>>, vector<32x64xf32>
    %c0_11 = arith.constant 0 : index
    %c0_12 = arith.constant 0 : index
    %9 = vector.load %arg10[%c0_11, %c0_12] : memref<1x64xf32, #tpu.memory_space<vmem>>, vector<1x64xf32>
    %c0_13 = arith.constant 0 : index
    %c0_14 = arith.constant 0 : index
    %10 = vector.load %arg11[%c0_13, %c0_14] : memref<64x16xf32, #tpu.memory_space<vmem>>, vector<64x16xf32>
    %c0_15 = arith.constant 0 : index
    %c0_16 = arith.constant 0 : index
    %11 = vector.load %arg12[%c0_15, %c0_16] : memref<1x16xf32, #tpu.memory_space<vmem>>, vector<1x16xf32>
    %c0_17 = arith.constant 0 : index
    %c0_18 = arith.constant 0 : index
    %12 = vector.load %arg13[%c0_17, %c0_18] : memref<1x16xf32, #tpu.memory_space<vmem>>, vector<1x16xf32>
    %c0_19 = arith.constant 0 : index
    %c0_20 = arith.constant 0 : index
    %13 = vector.load %arg14[%c0_19, %c0_20] : memref<1x1xf32, #tpu.memory_space<vmem>>, vector<1x1xf32>
    %c0_21 = arith.constant 0 : index
    %c0_22 = arith.constant 0 : index
    %14 = vector.load %arg3[%c0_21, %c0_22] : memref<2x32xf32, #tpu.memory_space<vmem>>, vector<2x32xf32>
    %c0_23 = arith.constant 0 : index
    %c0_24 = arith.constant 0 : index
    %15 = vector.load %arg4[%c0_23, %c0_24] : memref<2x32xf32, #tpu.memory_space<vmem>>, vector<2x32xf32>
    %c0_25 = arith.constant 0 : index
    %c0_26 = arith.constant 0 : index
    %16 = vector.load %arg2[%c0_25, %c0_26] : memref<2x1xf32, #tpu.memory_space<vmem>>, vector<2x1xf32>
    %cst_27 = arith.constant dense<0.000000e+00> : vector<2x128xf32>
    %17 = tpu.matmul %14, %7, %cst_27 {dimension_numbers = #tpu.dot_dimension_numbers<[1], [0], [0], [1], [0, 0, 1, 1], [], []>} : vector<2x32xf32>, vector<32x128xf32>, vector<2x128xf32> -> vector<2x128xf32>
    %18 = vector.extract_strided_slice %5 {offsets = [0, 0], sizes = [2, 128], strides = [1, 1]} : vector<64x128xf32> to vector<2x128xf32>
    %19 = vector.broadcast %16 : vector<2x1xf32> to vector<2x128xf32>
    %20 = vector.broadcast %6 : vector<1x128xf32> to vector<2x128xf32>
    %21 = arith.mulf %19, %20 : vector<2x128xf32>
    %22 = arith.addf %18, %21 : vector<2x128xf32>
    %23 = arith.addf %22, %17 : vector<2x128xf32>
    %24 = math.tanh %23 : vector<2x128xf32>
    %cst_28 = arith.constant 5.000000e-01 : f32
    %25 = vector.broadcast %cst_28 : f32 to vector<2x128xf32>
    %26 = arith.mulf %24, %25 : vector<2x128xf32>
    %cst_29 = arith.constant 5.000000e-01 : f32
    %27 = vector.broadcast %cst_29 : f32 to vector<2x128xf32>
    %28 = arith.addf %26, %27 : vector<2x128xf32>
    %29 = vector.extract_strided_slice %28 {offsets = [0, 0], sizes = [2, 32], strides = [1, 1]} : vector<2x128xf32> to vector<2x32xf32>
    %30 = vector.extract_strided_slice %28 {offsets = [0, 32], sizes = [2, 32], strides = [1, 1]} : vector<2x128xf32> to vector<2x32xf32>
    %31 = vector.extract_strided_slice %24 {offsets = [0, 64], sizes = [2, 32], strides = [1, 1]} : vector<2x128xf32> to vector<2x32xf32>
    %32 = vector.extract_strided_slice %28 {offsets = [0, 96], sizes = [2, 32], strides = [1, 1]} : vector<2x128xf32> to vector<2x32xf32>
    %33 = arith.mulf %30, %15 : vector<2x32xf32>
    %34 = arith.mulf %29, %31 : vector<2x32xf32>
    %35 = arith.addf %33, %34 : vector<2x32xf32>
    %36 = math.tanh %35 : vector<2x32xf32>
    %37 = arith.mulf %32, %36 : vector<2x32xf32>
    %cst_30 = arith.constant dense<0.000000e+00> : vector<2x64xf32>
    %38 = tpu.matmul %37, %8, %cst_30 {dimension_numbers = #tpu.dot_dimension_numbers<[1], [0], [0], [1], [0, 0, 1, 1], [], []>} : vector<2x32xf32>, vector<32x64xf32>, vector<2x64xf32> -> vector<2x64xf32>
    %cst_31 = arith.constant dense<0.000000e+00> : vector<2x128xf32>
    %39 = tpu.matmul %37, %7, %cst_31 {dimension_numbers = #tpu.dot_dimension_numbers<[1], [0], [0], [1], [0, 0, 1, 1], [], []>} : vector<2x32xf32>, vector<32x128xf32>, vector<2x128xf32> -> vector<2x128xf32>
    %40 = vector.broadcast %9 : vector<1x64xf32> to vector<2x64xf32>
    %41 = arith.addf %38, %40 : vector<2x64xf32>
    %cst_32 = arith.constant 0.000000e+00 : f32
    %42 = vector.broadcast %cst_32 : f32 to vector<2x64xf32>
    %43 = arith.maximumf %41, %42 : vector<2x64xf32>
    %cst_33 = arith.constant dense<0.000000e+00> : vector<2x16xf32>
    %44 = tpu.matmul %43, %10, %cst_33 {dimension_numbers = #tpu.dot_dimension_numbers<[1], [0], [0], [1], [0, 0, 1, 1], [], []>} : vector<2x64xf32>, vector<64x16xf32>, vector<2x16xf32> -> vector<2x16xf32>
    %45 = vector.broadcast %11 : vector<1x16xf32> to vector<2x16xf32>
    %46 = arith.addf %44, %45 : vector<2x16xf32>
    %cst_34 = arith.constant 0.000000e+00 : f32
    %47 = vector.broadcast %cst_34 : f32 to vector<2x16xf32>
    %48 = arith.maximumf %46, %47 : vector<2x16xf32>
    %49 = vector.broadcast %12 : vector<1x16xf32> to vector<2x16xf32>
    %50 = arith.mulf %48, %49 : vector<2x16xf32>
    %cst_35 = arith.constant dense<0.000000e+00> : vector<2xf32>
    %51 = vector.multi_reduction <add>, %50, %cst_35 [1] : vector<2x16xf32> to vector<2xf32>
    %52 = vector.shape_cast %51 : vector<2xf32> to vector<2x1xf32>
    %53 = vector.broadcast %13 : vector<1x1xf32> to vector<2x1xf32>
    %54 = arith.addf %52, %53 : vector<2x1xf32>
    %cst_36 = arith.constant 0.000000e+00 : f32
    %55 = vector.broadcast %cst_36 : f32 to vector<2x1xf32>
    %56 = arith.maximumf %54, %55 : vector<2x1xf32>
    %c0_37 = arith.constant 0 : index
    %c0_38 = arith.constant 0 : index
    %57 = vector.load %arg15[%c0_37, %c0_38] : memref<2x8xf32, #tpu.memory_space<vmem>>, vector<2x1xf32>
    tpu.vector_store %arg15[%c0_37, %c0_38], %56 {strides = array<i32>} : memref<2x8xf32, #tpu.memory_space<vmem>>, vector<2x1xf32>,
    %58 = vector.extract_strided_slice %5 {offsets = [8, 0], sizes = [2, 128], strides = [1, 1]} : vector<64x128xf32> to vector<2x128xf32>
    %59 = vector.broadcast %56 : vector<2x1xf32> to vector<2x128xf32>
    %60 = vector.broadcast %6 : vector<1x128xf32> to vector<2x128xf32>
    %61 = arith.mulf %59, %60 : vector<2x128xf32>
    %62 = arith.addf %58, %61 : vector<2x128xf32>
    %63 = arith.addf %62, %39 : vector<2x128xf32>
    %64 = math.tanh %63 : vector<2x128xf32>
    %cst_39 = arith.constant 5.000000e-01 : f32
    %65 = vector.broadcast %cst_39 : f32 to vector<2x128xf32>
    %66 = arith.mulf %64, %65 : vector<2x128xf32>
    %cst_40 = arith.constant 5.000000e-01 : f32
    %67 = vector.broadcast %cst_40 : f32 to vector<2x128xf32>
    %68 = arith.addf %66, %67 : vector<2x128xf32>
    %69 = vector.extract_strided_slice %68 {offsets = [0, 0], sizes = [2, 32], strides = [1, 1]} : vector<2x128xf32> to vector<2x32xf32>
    %70 = vector.extract_strided_slice %68 {offsets = [0, 32], sizes = [2, 32], strides = [1, 1]} : vector<2x128xf32> to vector<2x32xf32>
    %71 = vector.extract_strided_slice %64 {offsets = [0, 64], sizes = [2, 32], strides = [1, 1]} : vector<2x128xf32> to vector<2x32xf32>
    %72 = vector.extract_strided_slice %68 {offsets = [0, 96], sizes = [2, 32], strides = [1, 1]} : vector<2x128xf32> to vector<2x32xf32>
    %73 = arith.mulf %70, %35 : vector<2x32xf32>
    %74 = arith.mulf %69, %71 : vector<2x32xf32>
    %75 = arith.addf %73, %74 : vector<2x32xf32>
    %76 = math.tanh %75 : vector<2x32xf32>
    %77 = arith.mulf %72, %76 : vector<2x32xf32>
    %cst_41 = arith.constant dense<0.000000e+00> : vector<2x64xf32>
    %78 = tpu.matmul %77, %8, %cst_41 {dimension_numbers = #tpu.dot_dimension_numbers<[1], [0], [0], [1], [0, 0, 1, 1], [], []>} : vector<2x32xf32>, vector<32x64xf32>, vector<2x64xf32> -> vector<2x64xf32>
    %cst_42 = arith.constant dense<0.000000e+00> : vector<2x128xf32>
    %79 = tpu.matmul %77, %7, %cst_42 {dimension_numbers = #tpu.dot_dimension_numbers<[1], [0], [0], [1], [0, 0, 1, 1], [], []>} : vector<2x32xf32>, vector<32x128xf32>, vector<2x128xf32> -> vector<2x128xf32>
    %80 = vector.broadcast %9 : vector<1x64xf32> to vector<2x64xf32>
    %81 = arith.addf %78, %80 : vector<2x64xf32>
    %cst_43 = arith.constant 0.000000e+00 : f32
    %82 = vector.broadcast %cst_43 : f32 to vector<2x64xf32>
    %83 = arith.maximumf %81, %82 : vector<2x64xf32>
    %cst_44 = arith.constant dense<0.000000e+00> : vector<2x16xf32>
    %84 = tpu.matmul %83, %10, %cst_44 {dimension_numbers = #tpu.dot_dimension_numbers<[1], [0], [0], [1], [0, 0, 1, 1], [], []>} : vector<2x64xf32>, vector<64x16xf32>, vector<2x16xf32> -> vector<2x16xf32>
    %85 = vector.broadcast %11 : vector<1x16xf32> to vector<2x16xf32>
    %86 = arith.addf %84, %85 : vector<2x16xf32>
    %cst_45 = arith.constant 0.000000e+00 : f32
    %87 = vector.broadcast %cst_45 : f32 to vector<2x16xf32>
    %88 = arith.maximumf %86, %87 : vector<2x16xf32>
    %89 = vector.broadcast %12 : vector<1x16xf32> to vector<2x16xf32>
    %90 = arith.mulf %88, %89 : vector<2x16xf32>
    %cst_46 = arith.constant dense<0.000000e+00> : vector<2xf32>
    %91 = vector.multi_reduction <add>, %90, %cst_46 [1] : vector<2x16xf32> to vector<2xf32>
    %92 = vector.shape_cast %91 : vector<2xf32> to vector<2x1xf32>
    %93 = vector.broadcast %13 : vector<1x1xf32> to vector<2x1xf32>
    %94 = arith.addf %92, %93 : vector<2x1xf32>
    %cst_47 = arith.constant 0.000000e+00 : f32
    %95 = vector.broadcast %cst_47 : f32 to vector<2x1xf32>
    %96 = arith.maximumf %94, %95 : vector<2x1xf32>
    %c0_48 = arith.constant 0 : index
    %c1 = arith.constant 1 : index
    %97 = vector.load %arg15[%c0_48, %c1] : memref<2x8xf32, #tpu.memory_space<vmem>>, vector<2x1xf32>
    tpu.vector_store %arg15[%c0_48, %c1], %96 {strides = array<i32>} : memref<2x8xf32, #tpu.memory_space<vmem>>, vector<2x1xf32>,
    %98 = vector.extract_strided_slice %5 {offsets = [16, 0], sizes = [2, 128], strides = [1, 1]} : vector<64x128xf32> to vector<2x128xf32>
    %99 = vector.broadcast %96 : vector<2x1xf32> to vector<2x128xf32>
    %100 = vector.broadcast %6 : vector<1x128xf32> to vector<2x128xf32>
    %101 = arith.mulf %99, %100 : vector<2x128xf32>
    %102 = arith.addf %98, %101 : vector<2x128xf32>
    %103 = arith.addf %102, %79 : vector<2x128xf32>
    %104 = math.tanh %103 : vector<2x128xf32>
    %cst_49 = arith.constant 5.000000e-01 : f32
    %105 = vector.broadcast %cst_49 : f32 to vector<2x128xf32>
    %106 = arith.mulf %104, %105 : vector<2x128xf32>
    %cst_50 = arith.constant 5.000000e-01 : f32
    %107 = vector.broadcast %cst_50 : f32 to vector<2x128xf32>
    %108 = arith.addf %106, %107 : vector<2x128xf32>
    %109 = vector.extract_strided_slice %108 {offsets = [0, 0], sizes = [2, 32], strides = [1, 1]} : vector<2x128xf32> to vector<2x32xf32>
    %110 = vector.extract_strided_slice %108 {offsets = [0, 32], sizes = [2, 32], strides = [1, 1]} : vector<2x128xf32> to vector<2x32xf32>
    %111 = vector.extract_strided_slice %104 {offsets = [0, 64], sizes = [2, 32], strides = [1, 1]} : vector<2x128xf32> to vector<2x32xf32>
    %112 = vector.extract_strided_slice %108 {offsets = [0, 96], sizes = [2, 32], strides = [1, 1]} : vector<2x128xf32> to vector<2x32xf32>
    %113 = arith.mulf %110, %75 : vector<2x32xf32>
    %114 = arith.mulf %109, %111 : vector<2x32xf32>
    %115 = arith.addf %113, %114 : vector<2x32xf32>
    %116 = math.tanh %115 : vector<2x32xf32>
    %117 = arith.mulf %112, %116 : vector<2x32xf32>
    %cst_51 = arith.constant dense<0.000000e+00> : vector<2x64xf32>
    %118 = tpu.matmul %117, %8, %cst_51 {dimension_numbers = #tpu.dot_dimension_numbers<[1], [0], [0], [1], [0, 0, 1, 1], [], []>} : vector<2x32xf32>, vector<32x64xf32>, vector<2x64xf32> -> vector<2x64xf32>
    %cst_52 = arith.constant dense<0.000000e+00> : vector<2x128xf32>
    %119 = tpu.matmul %117, %7, %cst_52 {dimension_numbers = #tpu.dot_dimension_numbers<[1], [0], [0], [1], [0, 0, 1, 1], [], []>} : vector<2x32xf32>, vector<32x128xf32>, vector<2x128xf32> -> vector<2x128xf32>
    %120 = vector.broadcast %9 : vector<1x64xf32> to vector<2x64xf32>
    %121 = arith.addf %118, %120 : vector<2x64xf32>
    %cst_53 = arith.constant 0.000000e+00 : f32
    %122 = vector.broadcast %cst_53 : f32 to vector<2x64xf32>
    %123 = arith.maximumf %121, %122 : vector<2x64xf32>
    %cst_54 = arith.constant dense<0.000000e+00> : vector<2x16xf32>
    %124 = tpu.matmul %123, %10, %cst_54 {dimension_numbers = #tpu.dot_dimension_numbers<[1], [0], [0], [1], [0, 0, 1, 1], [], []>} : vector<2x64xf32>, vector<64x16xf32>, vector<2x16xf32> -> vector<2x16xf32>
    %125 = vector.broadcast %11 : vector<1x16xf32> to vector<2x16xf32>
    %126 = arith.addf %124, %125 : vector<2x16xf32>
    %cst_55 = arith.constant 0.000000e+00 : f32
    %127 = vector.broadcast %cst_55 : f32 to vector<2x16xf32>
    %128 = arith.maximumf %126, %127 : vector<2x16xf32>
    %129 = vector.broadcast %12 : vector<1x16xf32> to vector<2x16xf32>
    %130 = arith.mulf %128, %129 : vector<2x16xf32>
    %cst_56 = arith.constant dense<0.000000e+00> : vector<2xf32>
    %131 = vector.multi_reduction <add>, %130, %cst_56 [1] : vector<2x16xf32> to vector<2xf32>
    %132 = vector.shape_cast %131 : vector<2xf32> to vector<2x1xf32>
    %133 = vector.broadcast %13 : vector<1x1xf32> to vector<2x1xf32>
    %134 = arith.addf %132, %133 : vector<2x1xf32>
    %cst_57 = arith.constant 0.000000e+00 : f32
    %135 = vector.broadcast %cst_57 : f32 to vector<2x1xf32>
    %136 = arith.maximumf %134, %135 : vector<2x1xf32>
    %c0_58 = arith.constant 0 : index
    %c2 = arith.constant 2 : index
    %137 = vector.load %arg15[%c0_58, %c2] : memref<2x8xf32, #tpu.memory_space<vmem>>, vector<2x1xf32>
    tpu.vector_store %arg15[%c0_58, %c2], %136 {strides = array<i32>} : memref<2x8xf32, #tpu.memory_space<vmem>>, vector<2x1xf32>,
    %138 = vector.extract_strided_slice %5 {offsets = [24, 0], sizes = [2, 128], strides = [1, 1]} : vector<64x128xf32> to vector<2x128xf32>
    %139 = vector.broadcast %136 : vector<2x1xf32> to vector<2x128xf32>
    %140 = vector.broadcast %6 : vector<1x128xf32> to vector<2x128xf32>
    %141 = arith.mulf %139, %140 : vector<2x128xf32>
    %142 = arith.addf %138, %141 : vector<2x128xf32>
    %143 = arith.addf %142, %119 : vector<2x128xf32>
    %144 = math.tanh %143 : vector<2x128xf32>
    %cst_59 = arith.constant 5.000000e-01 : f32
    %145 = vector.broadcast %cst_59 : f32 to vector<2x128xf32>
    %146 = arith.mulf %144, %145 : vector<2x128xf32>
    %cst_60 = arith.constant 5.000000e-01 : f32
    %147 = vector.broadcast %cst_60 : f32 to vector<2x128xf32>
    %148 = arith.addf %146, %147 : vector<2x128xf32>
    %149 = vector.extract_strided_slice %148 {offsets = [0, 0], sizes = [2, 32], strides = [1, 1]} : vector<2x128xf32> to vector<2x32xf32>
    %150 = vector.extract_strided_slice %148 {offsets = [0, 32], sizes = [2, 32], strides = [1, 1]} : vector<2x128xf32> to vector<2x32xf32>
    %151 = vector.extract_strided_slice %144 {offsets = [0, 64], sizes = [2, 32], strides = [1, 1]} : vector<2x128xf32> to vector<2x32xf32>
    %152 = vector.extract_strided_slice %148 {offsets = [0, 96], sizes = [2, 32], strides = [1, 1]} : vector<2x128xf32> to vector<2x32xf32>
    %153 = arith.mulf %150, %115 : vector<2x32xf32>
    %154 = arith.mulf %149, %151 : vector<2x32xf32>
    %155 = arith.addf %153, %154 : vector<2x32xf32>
    %156 = math.tanh %155 : vector<2x32xf32>
    %157 = arith.mulf %152, %156 : vector<2x32xf32>
    %cst_61 = arith.constant dense<0.000000e+00> : vector<2x64xf32>
    %158 = tpu.matmul %157, %8, %cst_61 {dimension_numbers = #tpu.dot_dimension_numbers<[1], [0], [0], [1], [0, 0, 1, 1], [], []>} : vector<2x32xf32>, vector<32x64xf32>, vector<2x64xf32> -> vector<2x64xf32>
    %cst_62 = arith.constant dense<0.000000e+00> : vector<2x128xf32>
    %159 = tpu.matmul %157, %7, %cst_62 {dimension_numbers = #tpu.dot_dimension_numbers<[1], [0], [0], [1], [0, 0, 1, 1], [], []>} : vector<2x32xf32>, vector<32x128xf32>, vector<2x128xf32> -> vector<2x128xf32>
    %160 = vector.broadcast %9 : vector<1x64xf32> to vector<2x64xf32>
    %161 = arith.addf %158, %160 : vector<2x64xf32>
    %cst_63 = arith.constant 0.000000e+00 : f32
    %162 = vector.broadcast %cst_63 : f32 to vector<2x64xf32>
    %163 = arith.maximumf %161, %162 : vector<2x64xf32>
    %cst_64 = arith.constant dense<0.000000e+00> : vector<2x16xf32>
    %164 = tpu.matmul %163, %10, %cst_64 {dimension_numbers = #tpu.dot_dimension_numbers<[1], [0], [0], [1], [0, 0, 1, 1], [], []>} : vector<2x64xf32>, vector<64x16xf32>, vector<2x16xf32> -> vector<2x16xf32>
    %165 = vector.broadcast %11 : vector<1x16xf32> to vector<2x16xf32>
    %166 = arith.addf %164, %165 : vector<2x16xf32>
    %cst_65 = arith.constant 0.000000e+00 : f32
    %167 = vector.broadcast %cst_65 : f32 to vector<2x16xf32>
    %168 = arith.maximumf %166, %167 : vector<2x16xf32>
    %169 = vector.broadcast %12 : vector<1x16xf32> to vector<2x16xf32>
    %170 = arith.mulf %168, %169 : vector<2x16xf32>
    %cst_66 = arith.constant dense<0.000000e+00> : vector<2xf32>
    %171 = vector.multi_reduction <add>, %170, %cst_66 [1] : vector<2x16xf32> to vector<2xf32>
    %172 = vector.shape_cast %171 : vector<2xf32> to vector<2x1xf32>
    %173 = vector.broadcast %13 : vector<1x1xf32> to vector<2x1xf32>
    %174 = arith.addf %172, %173 : vector<2x1xf32>
    %cst_67 = arith.constant 0.000000e+00 : f32
    %175 = vector.broadcast %cst_67 : f32 to vector<2x1xf32>
    %176 = arith.maximumf %174, %175 : vector<2x1xf32>
    %c0_68 = arith.constant 0 : index
    %c3 = arith.constant 3 : index
    %177 = vector.load %arg15[%c0_68, %c3] : memref<2x8xf32, #tpu.memory_space<vmem>>, vector<2x1xf32>
    tpu.vector_store %arg15[%c0_68, %c3], %176 {strides = array<i32>} : memref<2x8xf32, #tpu.memory_space<vmem>>, vector<2x1xf32>,
    %178 = vector.extract_strided_slice %5 {offsets = [32, 0], sizes = [2, 128], strides = [1, 1]} : vector<64x128xf32> to vector<2x128xf32>
    %179 = vector.broadcast %176 : vector<2x1xf32> to vector<2x128xf32>
    %180 = vector.broadcast %6 : vector<1x128xf32> to vector<2x128xf32>
    %181 = arith.mulf %179, %180 : vector<2x128xf32>
    %182 = arith.addf %178, %181 : vector<2x128xf32>
    %183 = arith.addf %182, %159 : vector<2x128xf32>
    %184 = math.tanh %183 : vector<2x128xf32>
    %cst_69 = arith.constant 5.000000e-01 : f32
    %185 = vector.broadcast %cst_69 : f32 to vector<2x128xf32>
    %186 = arith.mulf %184, %185 : vector<2x128xf32>
    %cst_70 = arith.constant 5.000000e-01 : f32
    %187 = vector.broadcast %cst_70 : f32 to vector<2x128xf32>
    %188 = arith.addf %186, %187 : vector<2x128xf32>
    %189 = vector.extract_strided_slice %188 {offsets = [0, 0], sizes = [2, 32], strides = [1, 1]} : vector<2x128xf32> to vector<2x32xf32>
    %190 = vector.extract_strided_slice %188 {offsets = [0, 32], sizes = [2, 32], strides = [1, 1]} : vector<2x128xf32> to vector<2x32xf32>
    %191 = vector.extract_strided_slice %184 {offsets = [0, 64], sizes = [2, 32], strides = [1, 1]} : vector<2x128xf32> to vector<2x32xf32>
    %192 = vector.extract_strided_slice %188 {offsets = [0, 96], sizes = [2, 32], strides = [1, 1]} : vector<2x128xf32> to vector<2x32xf32>
    %193 = arith.mulf %190, %155 : vector<2x32xf32>
    %194 = arith.mulf %189, %191 : vector<2x32xf32>
    %195 = arith.addf %193, %194 : vector<2x32xf32>
    %196 = math.tanh %195 : vector<2x32xf32>
    %197 = arith.mulf %192, %196 : vector<2x32xf32>
    %cst_71 = arith.constant dense<0.000000e+00> : vector<2x64xf32>
    %198 = tpu.matmul %197, %8, %cst_71 {dimension_numbers = #tpu.dot_dimension_numbers<[1], [0], [0], [1], [0, 0, 1, 1], [], []>} : vector<2x32xf32>, vector<32x64xf32>, vector<2x64xf32> -> vector<2x64xf32>
    %cst_72 = arith.constant dense<0.000000e+00> : vector<2x128xf32>
    %199 = tpu.matmul %197, %7, %cst_72 {dimension_numbers = #tpu.dot_dimension_numbers<[1], [0], [0], [1], [0, 0, 1, 1], [], []>} : vector<2x32xf32>, vector<32x128xf32>, vector<2x128xf32> -> vector<2x128xf32>
    %200 = vector.broadcast %9 : vector<1x64xf32> to vector<2x64xf32>
    %201 = arith.addf %198, %200 : vector<2x64xf32>
    %cst_73 = arith.constant 0.000000e+00 : f32
    %202 = vector.broadcast %cst_73 : f32 to vector<2x64xf32>
    %203 = arith.maximumf %201, %202 : vector<2x64xf32>
    %cst_74 = arith.constant dense<0.000000e+00> : vector<2x16xf32>
    %204 = tpu.matmul %203, %10, %cst_74 {dimension_numbers = #tpu.dot_dimension_numbers<[1], [0], [0], [1], [0, 0, 1, 1], [], []>} : vector<2x64xf32>, vector<64x16xf32>, vector<2x16xf32> -> vector<2x16xf32>
    %205 = vector.broadcast %11 : vector<1x16xf32> to vector<2x16xf32>
    %206 = arith.addf %204, %205 : vector<2x16xf32>
    %cst_75 = arith.constant 0.000000e+00 : f32
    %207 = vector.broadcast %cst_75 : f32 to vector<2x16xf32>
    %208 = arith.maximumf %206, %207 : vector<2x16xf32>
    %209 = vector.broadcast %12 : vector<1x16xf32> to vector<2x16xf32>
    %210 = arith.mulf %208, %209 : vector<2x16xf32>
    %cst_76 = arith.constant dense<0.000000e+00> : vector<2xf32>
    %211 = vector.multi_reduction <add>, %210, %cst_76 [1] : vector<2x16xf32> to vector<2xf32>
    %212 = vector.shape_cast %211 : vector<2xf32> to vector<2x1xf32>
    %213 = vector.broadcast %13 : vector<1x1xf32> to vector<2x1xf32>
    %214 = arith.addf %212, %213 : vector<2x1xf32>
    %cst_77 = arith.constant 0.000000e+00 : f32
    %215 = vector.broadcast %cst_77 : f32 to vector<2x1xf32>
    %216 = arith.maximumf %214, %215 : vector<2x1xf32>
    %c0_78 = arith.constant 0 : index
    %c4 = arith.constant 4 : index
    %217 = vector.load %arg15[%c0_78, %c4] : memref<2x8xf32, #tpu.memory_space<vmem>>, vector<2x1xf32>
    tpu.vector_store %arg15[%c0_78, %c4], %216 {strides = array<i32>} : memref<2x8xf32, #tpu.memory_space<vmem>>, vector<2x1xf32>,
    %218 = vector.extract_strided_slice %5 {offsets = [40, 0], sizes = [2, 128], strides = [1, 1]} : vector<64x128xf32> to vector<2x128xf32>
    %219 = vector.broadcast %216 : vector<2x1xf32> to vector<2x128xf32>
    %220 = vector.broadcast %6 : vector<1x128xf32> to vector<2x128xf32>
    %221 = arith.mulf %219, %220 : vector<2x128xf32>
    %222 = arith.addf %218, %221 : vector<2x128xf32>
    %223 = arith.addf %222, %199 : vector<2x128xf32>
    %224 = math.tanh %223 : vector<2x128xf32>
    %cst_79 = arith.constant 5.000000e-01 : f32
    %225 = vector.broadcast %cst_79 : f32 to vector<2x128xf32>
    %226 = arith.mulf %224, %225 : vector<2x128xf32>
    %cst_80 = arith.constant 5.000000e-01 : f32
    %227 = vector.broadcast %cst_80 : f32 to vector<2x128xf32>
    %228 = arith.addf %226, %227 : vector<2x128xf32>
    %229 = vector.extract_strided_slice %228 {offsets = [0, 0], sizes = [2, 32], strides = [1, 1]} : vector<2x128xf32> to vector<2x32xf32>
    %230 = vector.extract_strided_slice %228 {offsets = [0, 32], sizes = [2, 32], strides = [1, 1]} : vector<2x128xf32> to vector<2x32xf32>
    %231 = vector.extract_strided_slice %224 {offsets = [0, 64], sizes = [2, 32], strides = [1, 1]} : vector<2x128xf32> to vector<2x32xf32>
    %232 = vector.extract_strided_slice %228 {offsets = [0, 96], sizes = [2, 32], strides = [1, 1]} : vector<2x128xf32> to vector<2x32xf32>
    %233 = arith.mulf %230, %195 : vector<2x32xf32>
    %234 = arith.mulf %229, %231 : vector<2x32xf32>
    %235 = arith.addf %233, %234 : vector<2x32xf32>
    %236 = math.tanh %235 : vector<2x32xf32>
    %237 = arith.mulf %232, %236 : vector<2x32xf32>
    %cst_81 = arith.constant dense<0.000000e+00> : vector<2x64xf32>
    %238 = tpu.matmul %237, %8, %cst_81 {dimension_numbers = #tpu.dot_dimension_numbers<[1], [0], [0], [1], [0, 0, 1, 1], [], []>} : vector<2x32xf32>, vector<32x64xf32>, vector<2x64xf32> -> vector<2x64xf32>
    %cst_82 = arith.constant dense<0.000000e+00> : vector<2x128xf32>
    %239 = tpu.matmul %237, %7, %cst_82 {dimension_numbers = #tpu.dot_dimension_numbers<[1], [0], [0], [1], [0, 0, 1, 1], [], []>} : vector<2x32xf32>, vector<32x128xf32>, vector<2x128xf32> -> vector<2x128xf32>
    %240 = vector.broadcast %9 : vector<1x64xf32> to vector<2x64xf32>
    %241 = arith.addf %238, %240 : vector<2x64xf32>
    %cst_83 = arith.constant 0.000000e+00 : f32
    %242 = vector.broadcast %cst_83 : f32 to vector<2x64xf32>
    %243 = arith.maximumf %241, %242 : vector<2x64xf32>
    %cst_84 = arith.constant dense<0.000000e+00> : vector<2x16xf32>
    %244 = tpu.matmul %243, %10, %cst_84 {dimension_numbers = #tpu.dot_dimension_numbers<[1], [0], [0], [1], [0, 0, 1, 1], [], []>} : vector<2x64xf32>, vector<64x16xf32>, vector<2x16xf32> -> vector<2x16xf32>
    %245 = vector.broadcast %11 : vector<1x16xf32> to vector<2x16xf32>
    %246 = arith.addf %244, %245 : vector<2x16xf32>
    %cst_85 = arith.constant 0.000000e+00 : f32
    %247 = vector.broadcast %cst_85 : f32 to vector<2x16xf32>
    %248 = arith.maximumf %246, %247 : vector<2x16xf32>
    %249 = vector.broadcast %12 : vector<1x16xf32> to vector<2x16xf32>
    %250 = arith.mulf %248, %249 : vector<2x16xf32>
    %cst_86 = arith.constant dense<0.000000e+00> : vector<2xf32>
    %251 = vector.multi_reduction <add>, %250, %cst_86 [1] : vector<2x16xf32> to vector<2xf32>
    %252 = vector.shape_cast %251 : vector<2xf32> to vector<2x1xf32>
    %253 = vector.broadcast %13 : vector<1x1xf32> to vector<2x1xf32>
    %254 = arith.addf %252, %253 : vector<2x1xf32>
    %cst_87 = arith.constant 0.000000e+00 : f32
    %255 = vector.broadcast %cst_87 : f32 to vector<2x1xf32>
    %256 = arith.maximumf %254, %255 : vector<2x1xf32>
    %c0_88 = arith.constant 0 : index
    %c5 = arith.constant 5 : index
    %257 = vector.load %arg15[%c0_88, %c5] : memref<2x8xf32, #tpu.memory_space<vmem>>, vector<2x1xf32>
    tpu.vector_store %arg15[%c0_88, %c5], %256 {strides = array<i32>} : memref<2x8xf32, #tpu.memory_space<vmem>>, vector<2x1xf32>,
    %258 = vector.extract_strided_slice %5 {offsets = [48, 0], sizes = [2, 128], strides = [1, 1]} : vector<64x128xf32> to vector<2x128xf32>
    %259 = vector.broadcast %256 : vector<2x1xf32> to vector<2x128xf32>
    %260 = vector.broadcast %6 : vector<1x128xf32> to vector<2x128xf32>
    %261 = arith.mulf %259, %260 : vector<2x128xf32>
    %262 = arith.addf %258, %261 : vector<2x128xf32>
    %263 = arith.addf %262, %239 : vector<2x128xf32>
    %264 = math.tanh %263 : vector<2x128xf32>
    %cst_89 = arith.constant 5.000000e-01 : f32
    %265 = vector.broadcast %cst_89 : f32 to vector<2x128xf32>
    %266 = arith.mulf %264, %265 : vector<2x128xf32>
    %cst_90 = arith.constant 5.000000e-01 : f32
    %267 = vector.broadcast %cst_90 : f32 to vector<2x128xf32>
    %268 = arith.addf %266, %267 : vector<2x128xf32>
    %269 = vector.extract_strided_slice %268 {offsets = [0, 0], sizes = [2, 32], strides = [1, 1]} : vector<2x128xf32> to vector<2x32xf32>
    %270 = vector.extract_strided_slice %268 {offsets = [0, 32], sizes = [2, 32], strides = [1, 1]} : vector<2x128xf32> to vector<2x32xf32>
    %271 = vector.extract_strided_slice %264 {offsets = [0, 64], sizes = [2, 32], strides = [1, 1]} : vector<2x128xf32> to vector<2x32xf32>
    %272 = vector.extract_strided_slice %268 {offsets = [0, 96], sizes = [2, 32], strides = [1, 1]} : vector<2x128xf32> to vector<2x32xf32>
    %273 = arith.mulf %270, %235 : vector<2x32xf32>
    %274 = arith.mulf %269, %271 : vector<2x32xf32>
    %275 = arith.addf %273, %274 : vector<2x32xf32>
    %276 = math.tanh %275 : vector<2x32xf32>
    %277 = arith.mulf %272, %276 : vector<2x32xf32>
    %cst_91 = arith.constant dense<0.000000e+00> : vector<2x64xf32>
    %278 = tpu.matmul %277, %8, %cst_91 {dimension_numbers = #tpu.dot_dimension_numbers<[1], [0], [0], [1], [0, 0, 1, 1], [], []>} : vector<2x32xf32>, vector<32x64xf32>, vector<2x64xf32> -> vector<2x64xf32>
    %cst_92 = arith.constant dense<0.000000e+00> : vector<2x128xf32>
    %279 = tpu.matmul %277, %7, %cst_92 {dimension_numbers = #tpu.dot_dimension_numbers<[1], [0], [0], [1], [0, 0, 1, 1], [], []>} : vector<2x32xf32>, vector<32x128xf32>, vector<2x128xf32> -> vector<2x128xf32>
    %280 = vector.broadcast %9 : vector<1x64xf32> to vector<2x64xf32>
    %281 = arith.addf %278, %280 : vector<2x64xf32>
    %cst_93 = arith.constant 0.000000e+00 : f32
    %282 = vector.broadcast %cst_93 : f32 to vector<2x64xf32>
    %283 = arith.maximumf %281, %282 : vector<2x64xf32>
    %cst_94 = arith.constant dense<0.000000e+00> : vector<2x16xf32>
    %284 = tpu.matmul %283, %10, %cst_94 {dimension_numbers = #tpu.dot_dimension_numbers<[1], [0], [0], [1], [0, 0, 1, 1], [], []>} : vector<2x64xf32>, vector<64x16xf32>, vector<2x16xf32> -> vector<2x16xf32>
    %285 = vector.broadcast %11 : vector<1x16xf32> to vector<2x16xf32>
    %286 = arith.addf %284, %285 : vector<2x16xf32>
    %cst_95 = arith.constant 0.000000e+00 : f32
    %287 = vector.broadcast %cst_95 : f32 to vector<2x16xf32>
    %288 = arith.maximumf %286, %287 : vector<2x16xf32>
    %289 = vector.broadcast %12 : vector<1x16xf32> to vector<2x16xf32>
    %290 = arith.mulf %288, %289 : vector<2x16xf32>
    %cst_96 = arith.constant dense<0.000000e+00> : vector<2xf32>
    %291 = vector.multi_reduction <add>, %290, %cst_96 [1] : vector<2x16xf32> to vector<2xf32>
    %292 = vector.shape_cast %291 : vector<2xf32> to vector<2x1xf32>
    %293 = vector.broadcast %13 : vector<1x1xf32> to vector<2x1xf32>
    %294 = arith.addf %292, %293 : vector<2x1xf32>
    %cst_97 = arith.constant 0.000000e+00 : f32
    %295 = vector.broadcast %cst_97 : f32 to vector<2x1xf32>
    %296 = arith.maximumf %294, %295 : vector<2x1xf32>
    %c0_98 = arith.constant 0 : index
    %c6 = arith.constant 6 : index
    %297 = vector.load %arg15[%c0_98, %c6] : memref<2x8xf32, #tpu.memory_space<vmem>>, vector<2x1xf32>
    tpu.vector_store %arg15[%c0_98, %c6], %296 {strides = array<i32>} : memref<2x8xf32, #tpu.memory_space<vmem>>, vector<2x1xf32>,
    %298 = vector.extract_strided_slice %5 {offsets = [56, 0], sizes = [2, 128], strides = [1, 1]} : vector<64x128xf32> to vector<2x128xf32>
    %299 = vector.broadcast %296 : vector<2x1xf32> to vector<2x128xf32>
    %300 = vector.broadcast %6 : vector<1x128xf32> to vector<2x128xf32>
    %301 = arith.mulf %299, %300 : vector<2x128xf32>
    %302 = arith.addf %298, %301 : vector<2x128xf32>
    %303 = arith.addf %302, %279 : vector<2x128xf32>
    %304 = math.tanh %303 : vector<2x128xf32>
    %cst_99 = arith.constant 5.000000e-01 : f32
    %305 = vector.broadcast %cst_99 : f32 to vector<2x128xf32>
    %306 = arith.mulf %304, %305 : vector<2x128xf32>
    %cst_100 = arith.constant 5.000000e-01 : f32
    %307 = vector.broadcast %cst_100 : f32 to vector<2x128xf32>
    %308 = arith.addf %306, %307 : vector<2x128xf32>
    %309 = vector.extract_strided_slice %308 {offsets = [0, 0], sizes = [2, 32], strides = [1, 1]} : vector<2x128xf32> to vector<2x32xf32>
    %310 = vector.extract_strided_slice %308 {offsets = [0, 32], sizes = [2, 32], strides = [1, 1]} : vector<2x128xf32> to vector<2x32xf32>
    %311 = vector.extract_strided_slice %304 {offsets = [0, 64], sizes = [2, 32], strides = [1, 1]} : vector<2x128xf32> to vector<2x32xf32>
    %312 = vector.extract_strided_slice %308 {offsets = [0, 96], sizes = [2, 32], strides = [1, 1]} : vector<2x128xf32> to vector<2x32xf32>
    %313 = arith.mulf %310, %275 : vector<2x32xf32>
    %314 = arith.mulf %309, %311 : vector<2x32xf32>
    %315 = arith.addf %313, %314 : vector<2x32xf32>
    %316 = math.tanh %315 : vector<2x32xf32>
    %317 = arith.mulf %312, %316 : vector<2x32xf32>
    %cst_101 = arith.constant dense<0.000000e+00> : vector<2x64xf32>
    %318 = tpu.matmul %317, %8, %cst_101 {dimension_numbers = #tpu.dot_dimension_numbers<[1], [0], [0], [1], [0, 0, 1, 1], [], []>} : vector<2x32xf32>, vector<32x64xf32>, vector<2x64xf32> -> vector<2x64xf32>
    %319 = vector.broadcast %9 : vector<1x64xf32> to vector<2x64xf32>
    %320 = arith.addf %318, %319 : vector<2x64xf32>
    %cst_102 = arith.constant 0.000000e+00 : f32
    %321 = vector.broadcast %cst_102 : f32 to vector<2x64xf32>
    %322 = arith.maximumf %320, %321 : vector<2x64xf32>
    %cst_103 = arith.constant dense<0.000000e+00> : vector<2x16xf32>
    %323 = tpu.matmul %322, %10, %cst_103 {dimension_numbers = #tpu.dot_dimension_numbers<[1], [0], [0], [1], [0, 0, 1, 1], [], []>} : vector<2x64xf32>, vector<64x16xf32>, vector<2x16xf32> -> vector<2x16xf32>
    %324 = vector.broadcast %11 : vector<1x16xf32> to vector<2x16xf32>
    %325 = arith.addf %323, %324 : vector<2x16xf32>
    %cst_104 = arith.constant 0.000000e+00 : f32
    %326 = vector.broadcast %cst_104 : f32 to vector<2x16xf32>
    %327 = arith.maximumf %325, %326 : vector<2x16xf32>
    %328 = vector.broadcast %12 : vector<1x16xf32> to vector<2x16xf32>
    %329 = arith.mulf %327, %328 : vector<2x16xf32>
    %cst_105 = arith.constant dense<0.000000e+00> : vector<2xf32>
    %330 = vector.multi_reduction <add>, %329, %cst_105 [1] : vector<2x16xf32> to vector<2xf32>
    %331 = vector.shape_cast %330 : vector<2xf32> to vector<2x1xf32>
    %332 = vector.broadcast %13 : vector<1x1xf32> to vector<2x1xf32>
    %333 = arith.addf %331, %332 : vector<2x1xf32>
    %cst_106 = arith.constant 0.000000e+00 : f32
    %334 = vector.broadcast %cst_106 : f32 to vector<2x1xf32>
    %335 = arith.maximumf %333, %334 : vector<2x1xf32>
    %c0_107 = arith.constant 0 : index
    %c7 = arith.constant 7 : index
    %336 = vector.load %arg15[%c0_107, %c7] : memref<2x8xf32, #tpu.memory_space<vmem>>, vector<2x1xf32>
    tpu.vector_store %arg15[%c0_107, %c7], %335 {strides = array<i32>} : memref<2x8xf32, #tpu.memory_space<vmem>>, vector<2x1xf32>,
    %c0_108 = arith.constant 0 : index
    %c0_109 = arith.constant 0 : index
    %337 = vector.load %arg16[%c0_108, %c0_109] : memref<2x32xf32, #tpu.memory_space<vmem>>, vector<2x32xf32>
    tpu.vector_store %arg16[%c0_108, %c0_109], %317 {strides = array<i32>} : memref<2x32xf32, #tpu.memory_space<vmem>>, vector<2x32xf32>,
    %c0_110 = arith.constant 0 : index
    %c0_111 = arith.constant 0 : index
    %338 = vector.load %arg17[%c0_110, %c0_111] : memref<2x32xf32, #tpu.memory_space<vmem>>, vector<2x32xf32>
    tpu.vector_store %arg17[%c0_110, %c0_111], %315 {strides = array<i32>} : memref<2x32xf32, #tpu.memory_space<vmem>>, vector<2x32xf32>,
    return
  }
  func.func @transform_0(%arg0: i32) -> (i32, i32) {
    %c0_i32 = arith.constant 0 : i32
    %c0_i32_0 = arith.constant 0 : i32
    %c0_i32_1 = arith.constant 0 : i32
    return %c0_i32, %c0_i32_0 : i32, i32
  }
  func.func @transform_1(%arg0: i32) -> (i32, i32) {
    %c0_i32 = arith.constant 0 : i32
    %c0_i32_0 = arith.constant 0 : i32
    %c0_i32_1 = arith.constant 0 : i32
    return %c0_i32, %c0_i32_0 : i32, i32
  }
  func.func @transform_2(%arg0: i32) -> (i32, i32) {
    %c0_i32 = arith.constant 0 : i32
    %c0_i32_0 = arith.constant 0 : i32
    %c0_i32_1 = arith.constant 0 : i32
    return %c0_i32, %c0_i32_0 : i32, i32
  }
  func.func @transform_3(%arg0: i32) -> (i32, i32) {
    %c0_i32 = arith.constant 0 : i32
    %c0_i32_0 = arith.constant 0 : i32
    %c0_i32_1 = arith.constant 0 : i32
    return %c0_i32, %c0_i32_0 : i32, i32
  }
  func.func @transform_4(%arg0: i32) -> (i32, i32) {
    %c0_i32 = arith.constant 0 : i32
    %c0_i32_0 = arith.constant 0 : i32
    %c0_i32_1 = arith.constant 0 : i32
    return %c0_i32, %c0_i32_0 : i32, i32
  }
  func.func @transform_5(%arg0: i32) -> (i32, i32) {
    %c0_i32 = arith.constant 0 : i32
    %c0_i32_0 = arith.constant 0 : i32
    %c0_i32_1 = arith.constant 0 : i32
    return %c0_i32, %c0_i32_0 : i32, i32
  }
  func.func @transform_6(%arg0: i32) -> (i32, i32) {
    %c0_i32 = arith.constant 0 : i32
    %c0_i32_0 = arith.constant 0 : i32
    %c0_i32_1 = arith.constant 0 : i32
    return %c0_i32, %c0_i32_0 : i32, i32
  }
  func.func @transform_7(%arg0: i32) -> (i32, i32) {
    %c0_i32 = arith.constant 0 : i32
    %c0_i32_0 = arith.constant 0 : i32
    %c0_i32_1 = arith.constant 0 : i32
    return %c0_i32, %c0_i32_0 : i32, i32
  }
  func.func @transform_8(%arg0: i32) -> (i32, i32) {
    %c0_i32 = arith.constant 0 : i32
    %c0_i32_0 = arith.constant 0 : i32
    %c0_i32_1 = arith.constant 0 : i32
    return %c0_i32, %c0_i32_0 : i32, i32
  }
  func.func @transform_9(%arg0: i32) -> (i32, i32) {
    %c0_i32 = arith.constant 0 : i32
    %c0_i32_0 = arith.constant 0 : i32
    %c0_i32_1 = arith.constant 0 : i32
    return %c0_i32, %c0_i32_0 : i32, i32
  }
  func.func @transform_10(%arg0: i32) -> (i32, i32) {
    %c0_i32 = arith.constant 0 : i32
    %c0_i32_0 = arith.constant 0 : i32
    %c0_i32_1 = arith.constant 0 : i32
    return %c0_i32, %c0_i32_0 : i32, i32
  }
  func.func @transform_11(%arg0: i32) -> (i32, i32) {
    %c0_i32 = arith.constant 0 : i32
    %c0_i32_0 = arith.constant 0 : i32
    %c0_i32_1 = arith.constant 0 : i32
    return %c0_i32, %c0_i32_0 : i32, i32
  }
  func.func @transform_12(%arg0: i32) -> (i32, i32) {
    %c0_i32 = arith.constant 0 : i32
    %c0_i32_0 = arith.constant 0 : i32
    %c0_i32_1 = arith.constant 0 : i32
    return %c0_i32, %c0_i32_0 : i32, i32
  }
  func.func @transform_13(%arg0: i32) -> (i32, i32) {
    %c0_i32 = arith.constant 0 : i32
    %c0_i32_0 = arith.constant 0 : i32
    %c0_i32_1 = arith.constant 0 : i32
    return %c0_i32, %c0_i32_0 : i32, i32
  }
  func.func @transform_14(%arg0: i32) -> (i32, i32) {
    %c0_i32 = arith.constant 0 : i32
    %c0_i32_0 = arith.constant 0 : i32
    %c0_i32_1 = arith.constant 0 : i32
    return %c0_i32, %c0_i32_0 : i32, i32
  }
  func.func @transform_15(%arg0: i32) -> (i32, i32) {
    %c0_i32 = arith.constant 0 : i32
    %c0_i32_0 = arith.constant 0 : i32
    %c0_i32_1 = arith.constant 0 : i32
    return %c0_i32, %c0_i32_0 : i32, i32
  }
  func.func @transform_16(%arg0: i32) -> (i32, i32) {
    %c0_i32 = arith.constant 0 : i32
    %c0_i32_0 = arith.constant 0 : i32
    %c0_i32_1 = arith.constant 0 : i32
    return %c0_i32, %c0_i32_0 : i32, i32
  }
}

</mosaic_0001>

<bundles_post_ra>
// kernel: snac_lnet_forward.1
= control target key start
LH: loop header
LB: loop body
LE: loop exit
PB: predicated region body
PF: predicated region fallthrough
CT: control target
= control target key end

     0   :  { %s3890_s0 = inlined_call_operand.vmem [shape: f32[64,11], index: 0, kind: input, shape index: {}]   ;;  %s3891_s1 = inlined_call_operand.vmem [shape: f32[2,1], index: 1, kind: input, shape index: {}]   ;;  %s3892_s2 = inlined_call_operand.vmem [shape: f32[2,32], index: 2, kind: input, shape index: {}]   ;;  %s3893_s3 = inlined_call_operand.vmem [shape: f32[2,32], index: 3, kind: input, shape index: {}]   ;;  %s3894_s4 = inlined_call_operand.vmem [shape: f32[11,128], index: 4, kind: input, shape index: {}]   ;;  %s3895_s5 = inlined_call_operand.vmem [shape: f32[1,128], index: 5, kind: input, shape index: {}]   ;;  %s3896_s6 = inlined_call_operand.vmem [shape: f32[32,128], index: 6, kind: input, shape index: {}]   ;;  %s3897_s7 = inlined_call_operand.vmem [shape: f32[32,64], index: 7, kind: input, shape index: {}]   ;;  %s3898_s8 = inlined_call_operand.vmem [shape: f32[1,128], index: 8, kind: input, shape index: {}]   ;;  %s3899_s9 = inlined_call_operand.vmem [shape: f32[1,64], index: 9, kind: input, shape index: {}]   ;;  %s3900_s10 = inlined_call_operand.vmem [shape: f32[64,16], index: 10, kind: input, shape index: {}]   ;;  %s3901_s11 = inlined_call_operand.vmem [shape: f32[1,16], index: 11, kind: input, shape index: {}]   ;;  %s3902_s12 = inlined_call_operand.vmem [shape: f32[1,16], index: 12, kind: input, shape index: {}]   ;;  %s3903_s13 = inlined_call_operand.<no memory space> [shape: f32[1,1], index: 13, kind: input, shape index: {}]   ;;  %s3904_s14 = inlined_call_operand.hbm [shape: f32[2,8], index: 14, kind: output, shape index: {0}]   ;;  %s3905_s15 = inlined_call_operand.hbm [shape: f32[2,32], index: 15, kind: output, shape index: {1}]   ;;  %s3906_s16 = inlined_call_operand.hbm [shape: f32[2,32], index: 16, kind: output, shape index: {2}]  }
   0x1   :  { %3908 = sst [smem:[#allocation10_spill]] %s3890_s0  ;;  %v22_v0 = vstv %s3903_s13 }
   0x2   :  { %23 = vst [vmem:[#allocation2] sm:$0x1] %v22_v0 }
   0x3   :  { %24 = vsyncpa [#allocation4], 0  ;;  %v62_v1 = vld [vmem:[%s3894_s4] sm:$0xff]  ;;  %v63_v2 = vld [vmem:[%s3894_s4 + $0x8] sm:$0x7]  ;;  %vm96_vm0 = vcmask 1042432  }
   0x4   :  { %s3909_s29 = sld [smem:[#allocation10_spill]]  ;;  %v2933_v4 = vpack.c.bf16 %v63_v2, %v62_v1  ;;  %vm3255_vm1 = vmmov 1   ;;  %vm71_vm3 = vcmask 89088   ;;  %v206_v5 = vld [vmem:[%s3896_s6] sm:$0xff]  ;;  %v207_v6 = vld [vmem:[%s3896_s6 + $0x8] sm:$0xff]  ;;  %v208_v12 = vld [vmem:[%s3896_s6 + $0x10] sm:$0xff] }
   0x5   :  { %vm2934_vm2 = vmpackc.low %vm96_vm0, %vm3255_vm1  ;;  %v3383_v9 = vpack.c.bf16 %v207_v6, %v206_v5  ;;  %v3256_v13 = vmov 0.0|0.0   ;;  %v209_v14 = vld [vmem:[%s3896_s6 + $0x18] sm:$0xff]  ;;  %v227_v15 = vld [vmem:[%s3893_s3] sm:$0x3] }
   0x6   :  { %3131 = vmatprep.subr.msk.bf16.mxu1 %vm2934_vm2, %v2933_v4  ;;  %2935 = vmatprep.subr.msk.bf16.mxu0 %vm2934_vm2, %v2933_v4 }
   0x7   :  { %3132 = vmatpush3.bf16.msk.msra.mxu1 %vm2934_vm2, %v2933_v4  ;;  %2938 = vmatpush3.bf16.msk.msra.mxu0 %vm2934_vm2, %v2933_v4 }
   0x8   :  { %2939 = vmatprep.subr.bf16.mxu1 %v3256_v13 }
   0xa   :  { %v58_v3 = vld [vmem:[%s3909_s29 + $0x20] sm:$0xff]  ;;  %v59_v8 = vld [vmem:[%s3909_s29 + $0x28] sm:$0xff]  ;;  %v60_v11 = vld [vmem:[%s3909_s29 + $0x30] sm:$0xff] }
   0xb   :  { %2599 = vmatprep.mubr.msk.f32.mxu1 %vm71_vm3, %v58_v3  ;;  %v54_v7 = vld [vmem:[%s3909_s29] sm:$0xff]  ;;  %v55_v10 = vld [vmem:[%s3909_s29 + $0x8] sm:$0xff] }
   0xc   :  { %2593 = vmatprep.mubr.msk.f32.mxu0 %vm71_vm3, %v54_v7 }
   0xd   :  { %25 = vsyncpa [#allocation6], 0  ;;  %v3257_v16 = vmov 0   ;;  %v228_v17 = vld [vmem:[%s3891_s1] sm:$0x3]  ;;  %s3258_s4 = smov 32   ;;  %2600 = vmatmul.mubr.msk.f32.vlgmr.msra.gmra.mrb[0].mxu1 %vm71_vm3, %v59_v8  ;;  %2594 = vmatmul.mubr.msk.f32.vlgmr.msra.gmra.mrb[0].mxu0 %vm71_vm3, %v55_v10  ;;  %v3413_v19 = vpack.c.bf16 %v209_v14, %v208_v12 }
   0xe   :  { %3151 = vset.pattern.permute.xlu0 %v3257_v16  ;;  %321 = vrot.lane.b32.xlu1 %v227_v15, %s3258_s4  ;;  %v61_v18 = vld [vmem:[%s3909_s29 + $0x38] sm:$0xff]  ;;  %vm3259_vm4 = vmmov 0   ;;  %v3260_v20 = vmov 0.0   ;;  %v226_v21 = vld [vmem:[%s3892_s2] sm:$0x3]  ;;  %vm229_vm5 = vcmask 261120  }
   0xf   :  { %2941 = vmatpush3.bf16.msra.mxu1 %v3383_v9  ;;  %2602 = vmatprep.mubr.msk.f32.mxu1 %vm71_vm3, %v60_v11  ;;  %v3435_v23 = vld [vmem:[%s3895_s5] ss:$0 sm:$0xff]  ;;  %s3261_s5 = smov 64   ;;  %v211_v47 = vld [vmem:[%s3897_s7 + $0x8] sm:$0xff]  ;;  %v56_v48 = vld [vmem:[%s3909_s29 + $0x10] sm:$0xff]  ;;  %vm499_vm6 = vcmask 523264  }
  0x10   :  { %2942 = vmatprep.subr.bf16.mxu1 %v3256_v13  ;;  %305 = vperm.xlu0 %3151, %v228_v17   ;;  %v3444_v26 = vld [vmem:[%s3898_s8] ss:$0 sm:$0xff]  ;;  %v57_v50 = vld [vmem:[%s3909_s29 + $0x18] sm:$0xff]  ;;  %v212_v51 = vld [vmem:[%s3897_s7 + $0x10] sm:$0xff]  ;;  %vm581_vm7 = vcmask 123904   ;;  %vm593_vm8 = vcmask 1024  }
  0x11   :  { %2951 = vmatprep.subr.bf16.mxu0 %v3256_v13  ;;  %3152 = vset.pattern.permute.xlu1 %v3257_v16  ;;  %v210_v46 = vld [vmem:[%s3897_s7] sm:$0xff]  ;;  %v213_v52 = vld [vmem:[%s3897_s7 + $0x18] sm:$0xff]  ;;  %v216_v60 = vld [vmem:[%s3900_s10 + $0x8] sm:$0xff]  ;;  %s3264_s0 = smov 3   ;;  %s3265_s17 = smov 4   ;;  %vm2340_vm9 = vcmask 254976  }
  0x12   :  { %2603 = vmatmul.mubr.msk.f32.gmra.mrb[2].mxu1 %vm71_vm3, %v61_v18  ;;  %v3468_v49 = vpack.c.bf16 %v211_v47, %v210_v46  ;;  %2596 = vmatprep.mubr.msk.f32.mxu0 %vm71_vm3, %v56_v48  ;;  %v3482_v53 = vpack.c.bf16 %v213_v52, %v212_v51  ;;  %v215_v59 = vld [vmem:[%s3900_s10] sm:$0xff]  ;;  %v217_v62 = vld [vmem:[%s3900_s10 + $0x10] sm:$0xff]  ;;  %v218_v63 = vld [vmem:[%s3900_s10 + $0x18] sm:$0xff]  ;;  %vm853_vm10 = vcmask 9224   ;;  %vm1112_vm11 = vcmask 17424   ;;  %s3268_s7 = smov [#allocation5]  }
  0x13   :  { %2944 = vmatpush3.bf16.msra.mxu1 %v3413_v19  ;;  %2613 = vmatprep.mubr.msk.f32.mxu1 %vm3259_vm4, %v3260_v20  ;;  %v3501_v61 = vpack.c.bf16 %v216_v60, %v215_v59  ;;  %v3512_v1 = vpack.c.bf16 %v218_v63, %v217_v62  ;;  %v219_v2 = vld [vmem:[%s3900_s10 + $0x20] sm:$0xff]  ;;  %v220_v3 = vld [vmem:[%s3900_s10 + $0x28] sm:$0xff]  ;;  %v221_v5 = vld [vmem:[%s3900_s10 + $0x30] sm:$0xff]  ;;  %vm1371_vm12 = vcmask 25624   ;;  %vm1630_vm13 = vcmask 33824   ;;  %s2363_s29 = sshll.u32 %s3268_s7, 4  ;;  %s2364_s29 = int_to_ptr.vmem [resolvable:$true] %s2363_s29 }
  0x14   :  { %2945 = vmatprep.subr.bf16.mxu1 %v3256_v13  ;;  %2597 = vmatmul.mubr.msk.f32.gmra.mrb[2].mxu0 %vm71_vm3, %v57_v50  ;;  %v3528_v4 = vpack.c.bf16 %v220_v3, %v219_v2  ;;  %v222_v6 = vld [vmem:[%s3900_s10 + $0x38] sm:$0xff]  ;;  %v3548_v8 = vld [vmem:[%s3899_s9] ss:$0 sm:$0xff]  ;;  %s3185_s6 = scalar_lea.vmem %s2364_s29, 32  ;;  %p3190_p1 = scmp.lt.s32.totalorder %s2364_s29, %s2364_s29 }
  0x15   :  { %2953 = vmatpush3.bf16.msra.mxu0 %v3468_v49  ;;  %2635 = vmatprep.mubr.msk.f32.mxu0 %vm3259_vm4, %v3260_v20  ;;  %v3541_v7 = vpack.c.bf16 %v222_v6, %v221_v5  ;;  %v3565_v17 = vld [vmem:[%s3901_s11] ss:$0 sm:$0xff]  ;;  %s3262_s11 = smov 1   ;;  %p3186_p0 = scmp.ne.s32.totalorder %s2364_s29, %s3185_s6 }
  0x16   :  { %2614 = vmatmul.mubr.msk.f32.vlgmr.msra.gmra.mrb[4].mxu1 %vm229_vm5, %v226_v21  ;;  %2954 = vmatprep.subr.bf16.mxu0 %v3256_v13  ;;  %p3191_p2 = scmp.lt.s32.totalorder %s3185_s6, %s3185_s6 }
  0x17   :  { %2947 = vmatpush3.bf16.msra.mxu1 %v3383_v9  ;;  %2624 = vmatprep.mubr.msk.f32.mxu1 %vm3259_vm4, %v3260_v20 }
  0x18   :  { %2948 = vmatprep.subr.bf16.mxu1 %v3256_v13  ;;  %p3192_p3 = por %p3191_p2, %p3190_p1 }
  0x19   :  { %2956 = vmatpush3.bf16.msra.mxu0 %v3482_v53 }
  0x1a   :  { %2969 = vmatprep.subr.bf16.mxu0 %v3256_v13  ;;  %p3193_p4 = pnand %p3192_p3, %p3186_p0 }
  0x1b   :  { %2950 = vmatpush3.bf16.msra.mxu1 %v3413_v19 }
  0x1c   :  { %2957 = vmatprep.subr.bf16.mxu1 %v3256_v13 }
  0x80   :  { %v322_v42 = vpop.permute.xlu1 %321 }
  0x8f   :  { %v306_v22 = vpop.permute.xlu0 %305 }
  0x90   :  { %v314_v28 = vmul.f32 %v3435_v23, %v306_v22 }
  0xe0   :  { %v3437_v24 = vpop.f32.mrb[0].mxu1  ;;  %v3439_v25 = vpop.f32.mrb[0].mxu0 }
  0xe1   :  { %v3446_v27 = vpop.f32.mrb[1].mxu1  ;;  %v166_v29 = vpop.f32.mrb[1].mxu0 }
  0xe2   :  { %v167_v30 = vadd.f32 %v3444_v26, %v166_v29 }
  0xe4   :  { %v315_v33 = vadd.f32 %v314_v28, %v167_v30  ;;  %v3571_v28 = vld [vmem:[%s3902_s12] ss:$0 sm:$0xff]  ;;  %s3263_s12 = smov 2  }
  0xe5   :  { %v3450_v31 = vpop.f32.mrb[2].mxu1 }
  0xe6   :  { %v3452_v32 = vpop.f32.mrb[3].mxu1 }
  0xe7   :  { %v3491_v57 = vpop.f32.mrb[2].mxu0 }
  0xe8   :  { %v3493_v58 = vpop.f32.mrb[3].mxu0 }
  0xe9   :  { %v299_v34 = vpop.f32.mrb[4].mxu1 }
  0xea   :  { %v316_v35 = vadd.f32 %v315_v33, %v299_v34  ;;  %v2615_v36 = vpop.f32.mrb[5].mxu1  ;;  %v3575_v34 = vld [vmem:[#allocation2] ss:$0 sm:$0xff] }
  0xec   :  { %3153 = vtanh.f32 %v316_v35 }
  0xf6   :  { %v3154_v37 = vpop.eup %3153 }
  0xf7   :  { %326 = vrot.lane.b32.xlu0 %v3154_v37, %s3261_s5  ;;  %v318_v38 = vmul.f32 0.5, %v3154_v37 }
  0xf9   :  { %v319_v39 = vadd.f32 0.5, %v318_v38 }
  0xfb   :  { %v324_v43 = vmul.f32 %v322_v42, %v319_v39 }
 0x169   :  { %v327_v40 = vpop.permute.xlu0 %326 }
 0x16a   :  { %v329_v41 = vmul.f32 %v327_v40, %v319_v39 }
 0x16c   :  { %331 = vrot.lane.b32.xlu1 %v329_v41, %s3258_s4 }
 0x1de   :  { %v332_v44 = vpop.permute.xlu1 %331 }
 0x1df   :  { %v3456_v45 = vadd.f32 %v332_v44, %v324_v43 }
 0x1e1   :  { %3155 = vtanh.f32 %v3456_v45 }
 0x1eb   :  { %v3156_v54 = vpop.eup %3155 }
 0x1ec   :  { %337 = vrot.lane.b32.xlu0 %v3156_v54, %s3261_s5 }
 0x25e   :  { %v338_v55 = vpop.permute.xlu0 %337 }
 0x25f   :  { %v340_v56 = vmul.f32 %v338_v55, %v319_v39  ;;  %v172_v39 = vadd.f32 %v3439_v25, %v3444_v26 }
 0x261   :  { %342 = vrot.lane.b32.xlu1 %v340_v56, %s3258_s4 }
 0x2d3   :  { %v343_v0 = vpop.permute.xlu1 %342 }
 0x2d4   :  { %2625 = vmatmul.mubr.msk.f32.vlgmr.msra.gmra.mrb[6].mxu1 %vm229_vm5, %v343_v0  ;;  %2636 = vmatmul.mubr.msk.f32.vlgmr.msra.gmra.mrb[4].mxu0 %vm229_vm5, %v343_v0 }
 0x2d5   :  { %2959 = vmatpush3.bf16.msra.mxu1 %v3501_v61  ;;  %2654 = vmatprep.mubr.msk.f32.mxu1 %vm3259_vm4, %v3260_v20 }
 0x2d6   :  { %2960 = vmatprep.subr.bf16.mxu1 %v3256_v13  ;;  %2971 = vmatpush3.bf16.msra.mxu0 %v3383_v9 }
 0x2d7   :  { %2972 = vmatprep.subr.bf16.mxu0 %v3256_v13  ;;  %2665 = vmatprep.mubr.msk.f32.mxu0 %vm3259_vm4, %v3260_v20 }
 0x2d9   :  { %2962 = vmatpush3.bf16.msra.mxu1 %v3512_v1 }
 0x2da   :  { %2963 = vmatprep.subr.bf16.mxu1 %v3256_v13  ;;  %2974 = vmatpush3.bf16.msra.mxu0 %v3413_v19 }
 0x2db   :  { %2975 = vmatprep.subr.bf16.mxu0 %v3256_v13 }
 0x2dd   :  { %2965 = vmatpush3.bf16.msra.mxu1 %v3528_v4 }
 0x2de   :  { %2966 = vmatprep.subr.bf16.mxu1 %v3256_v13 }
 0x2e1   :  { %2968 = vmatpush3.bf16.msra.mxu1 %v3541_v7 }
 0x2e2   :  { %2981 = vmatprep.subr.bf16.mxu1 %v3256_v13 }
 0x3a7   :  { %v412_v10 = vpop.f32.mrb[6].mxu1  ;;  %v488_v11 = vpop.f32.mrb[4].mxu0 }
 0x3a8   :  { %v489_v12 = vadd.f32 %v3548_v8, %v488_v11  ;;  %v2626_v14 = vpop.f32.mrb[7].mxu1  ;;  %v2637_v15 = vpop.f32.mrb[5].mxu0 }
 0x3aa   :  { %v492_v16 = vmax.f32 %v489_v12, 0.0 }
 0x3ac   :  { %2655 = vmatmul.mubr.msk.f32.vlgmr.msra.gmra.mrb[8].mxu1 %vm499_vm6, %v492_v16 }
 0x3ad   :  { %2983 = vmatpush3.bf16.msra.mxu1 %v3501_v61  ;;  %2695 = vmatprep.mubr.msk.f32.mxu1 %vm3259_vm4, %v3260_v20 }
 0x3ae   :  { %2984 = vmatprep.subr.bf16.mxu1 %v3256_v13 }
 0x3b1   :  { %2986 = vmatpush3.bf16.msra.mxu1 %v3512_v1 }
 0x3b2   :  { %2987 = vmatprep.subr.bf16.mxu1 %v3256_v13 }
 0x3b5   :  { %2989 = vmatpush3.bf16.msra.mxu1 %v3528_v4 }
 0x3b6   :  { %2990 = vmatprep.subr.bf16.mxu1 %v3256_v13 }
 0x3b9   :  { %2992 = vmatpush3.bf16.msra.mxu1 %v3541_v7 }
 0x3ba   :  { %3005 = vmatprep.subr.bf16.mxu1 %v3256_v13 }
 0x47f   :  { %v569_v18 = vpop.f32.mrb[8].mxu1 }
 0x480   :  { %v570_v21 = vadd.f32 %v3565_v17, %v569_v18  ;;  %v2656_v22 = vpop.f32.mrb[9].mxu1  ;;  %v177_v18 = vadd.f32 %v3444_v26, %v3493_v58 }
 0x482   :  { %v573_v29 = vmax.f32 %v570_v21, 0.0 }
 0x484   :  { %v580_v30 = vmul.f32 %v3571_v28, %v573_v29 }
 0x486   :  { %v582_v33 = vsel %vm581_vm7, %v580_v30, 0.0 }
 0x487   :  { %583 = vadd.xlane.f32.xlu0 %v582_v33 }
 0x514   :  { %v584_v35 = vpop.xlane.xlu0 %583 }
 0x515   :  { %v591_v36 = vadd.f32 %v3575_v34, %v584_v35 }
 0x517   :  { %v592_v37 = vmax.f32 %v591_v36, 0.0 }
 0x519   :  { %594 = vst.msk [vmem:[#allocation3] sm:$0x3] %vm593_vm8, %v592_v37  ;;  %597 = vperm.xlu1 %3152, %v592_v37  }
 0x598   :  { %v598_v38 = vpop.permute.xlu1 %597 }
 0x599   :  { %v600_v40 = vmul.f32 %v3435_v23, %v598_v38 }
 0x59b   :  { %v601_v41 = vadd.f32 %v600_v40, %v172_v39 }
 0x59d   :  { %v602_v42 = vadd.f32 %v601_v41, %v412_v10 }
 0x59f   :  { %3157 = vtanh.f32 %v602_v42 }
 0x5a9   :  { %v3158_v43 = vpop.eup %3157 }
 0x5aa   :  { %608 = vrot.lane.b32.xlu1 %v3158_v43, %s3261_s5  ;;  %v604_v44 = vmul.f32 0.5, %v3158_v43 }
 0x5ac   :  { %v605_v46 = vadd.f32 0.5, %v604_v44 }
 0x5ae   :  { %v606_v50 = vmul.f32 %v605_v46, %v3456_v45 }
 0x61c   :  { %v609_v47 = vpop.permute.xlu1 %608 }
 0x61d   :  { %v611_v48 = vmul.f32 %v609_v47, %v605_v46 }
 0x61f   :  { %613 = vrot.lane.b32.xlu1 %v611_v48, %s3258_s4 }
 0x691   :  { %v614_v51 = vpop.permute.xlu1 %613 }
 0x692   :  { %v616_v52 = vadd.f32 %v614_v51, %v606_v50 }
 0x694   :  { %3159 = vtanh.f32 %v616_v52 }
 0x69e   :  { %v3160_v25 = vpop.eup %3159 }
 0x69f   :  { %619 = vrot.lane.b32.xlu1 %v3160_v25, %s3261_s5 }
 0x711   :  { %v620_v54 = vpop.permute.xlu1 %619 }
 0x712   :  { %v622_v55 = vmul.f32 %v620_v54, %v605_v46 }
 0x714   :  { %624 = vrot.lane.b32.xlu1 %v622_v55, %s3258_s4 }
 0x786   :  { %v625_v56 = vpop.permute.xlu1 %624 }
 0x787   :  { %2666 = vmatmul.mubr.msk.f32.vlgmr.msra.gmra.mrb[6].mxu0 %vm229_vm5, %v625_v56 }
 0x788   :  { %2977 = vmatpush3.bf16.msra.mxu0 %v3468_v49  ;;  %2676 = vmatprep.mubr.msk.f32.mxu0 %vm3259_vm4, %v3260_v20 }
 0x789   :  { %2978 = vmatprep.subr.bf16.mxu0 %v3256_v13 }
 0x78c   :  { %2980 = vmatpush3.bf16.msra.mxu0 %v3482_v53 }
 0x78d   :  { %2993 = vmatprep.subr.bf16.mxu0 %v3256_v13 }
 0x78f   :  { %2677 = vmatmul.mubr.msk.f32.vlgmr.msra.gmra.mrb[8].mxu0 %vm229_vm5, %v625_v56 }
 0x790   :  { %2995 = vmatpush3.bf16.msra.mxu0 %v3383_v9  ;;  %2706 = vmatprep.mubr.msk.f32.mxu0 %vm3259_vm4, %v3260_v20 }
 0x791   :  { %2996 = vmatprep.subr.bf16.mxu0 %v3256_v13 }
 0x794   :  { %2998 = vmatpush3.bf16.msra.mxu0 %v3413_v19 }
 0x795   :  { %2999 = vmatprep.subr.bf16.mxu0 %v3256_v13 }
 0x85a   :  { %v694_v45 = vpop.f32.mrb[6].mxu0 }
 0x85b   :  { %v2667_v59 = vpop.f32.mrb[7].mxu0 }
 0x862   :  { %v764_v60 = vpop.f32.mrb[8].mxu0 }
 0x863   :  { %v765_v62 = vadd.f32 %v3548_v8, %v764_v60  ;;  %v2678_v63 = vpop.f32.mrb[9].mxu0 }
 0x865   :  { %v768_v0 = vmax.f32 %v765_v62, 0.0 }
 0x867   :  { %2696 = vmatmul.mubr.msk.f32.vlgmr.msra.gmra.mrb[10].mxu1 %vm499_vm6, %v768_v0  ;;  %v182_v0 = vadd.f32 %v3491_v57, %v3444_v26 }
 0x868   :  { %3007 = vmatpush3.bf16.msra.mxu1 %v3501_v61  ;;  %2736 = vmatprep.mubr.msk.f32.mxu1 %vm3259_vm4, %v3260_v20 }
 0x869   :  { %3008 = vmatprep.subr.bf16.mxu1 %v3256_v13 }
 0x86c   :  { %3010 = vmatpush3.bf16.msra.mxu1 %v3512_v1 }
 0x86d   :  { %3011 = vmatprep.subr.bf16.mxu1 %v3256_v13 }
 0x870   :  { %3013 = vmatpush3.bf16.msra.mxu1 %v3528_v4 }
 0x871   :  { %3014 = vmatprep.subr.bf16.mxu1 %v3256_v13 }
 0x874   :  { %3016 = vmatpush3.bf16.msra.mxu1 %v3541_v7 }
 0x875   :  { %3029 = vmatprep.subr.bf16.mxu1 %v3256_v13 }
 0x93a   :  { %v838_v2 = vpop.f32.mrb[10].mxu1 }
 0x93b   :  { %v839_v3 = vadd.f32 %v3565_v17, %v838_v2  ;;  %v2697_v5 = vpop.f32.mrb[11].mxu1 }
 0x93d   :  { %v842_v6 = vmax.f32 %v839_v3, 0.0 }
 0x93f   :  { %v843_v10 = vmul.f32 %v3571_v28, %v842_v6 }
 0x941   :  { %v844_v11 = vsel %vm581_vm7, %v843_v10, 0.0 }
 0x942   :  { %845 = vadd.xlane.f32.xlu1 %v844_v11 }
 0x9cf   :  { %v846_v12 = vpop.xlane.xlu1 %845 }
 0x9d0   :  { %v3616_v14 = vadd.f32 %v3575_v34, %v846_v12 }
 0x9d2   :  { %v848_v15 = vmax.f32 %v3616_v14, 0.0 }
 0x9d4   :  { %856 = vperm.xlu0 %3151, %v848_v15  }
 0xa53   :  { %v857_v16 = vpop.permute.xlu0 %856 }
 0xa54   :  { %v859_v21 = vmul.f32 %v3435_v23, %v857_v16 }
 0xa56   :  { %v860_v22 = vadd.f32 %v859_v21, %v177_v18 }
 0xa58   :  { %v861_v29 = vadd.f32 %v860_v22, %v694_v45 }
 0xa5a   :  { %3161 = vtanh.f32 %v861_v29 }
 0xa64   :  { %v3162_v30 = vpop.eup %3161 }
 0xa65   :  { %867 = vrot.lane.b32.xlu0 %v3162_v30, %s3261_s5  ;;  %v863_v33 = vmul.f32 0.5, %v3162_v30 }
 0xa67   :  { %v864_v35 = vadd.f32 0.5, %v863_v33 }
 0xa69   :  { %v865_v38 = vmul.f32 %v864_v35, %v616_v52 }
 0xad7   :  { %v868_v36 = vpop.permute.xlu0 %867 }
 0xad8   :  { %v870_v37 = vmul.f32 %v868_v36, %v864_v35 }
 0xada   :  { %872 = vrot.lane.b32.xlu1 %v870_v37, %s3258_s4 }
 0xb4c   :  { %v873_v39 = vpop.permute.xlu1 %872 }
 0xb4d   :  { %v875_v40 = vadd.f32 %v873_v39, %v865_v38 }
 0xb4f   :  { %3163 = vtanh.f32 %v875_v40 }
 0xb59   :  { %v3164_v41 = vpop.eup %3163 }
 0xb5a   :  { %878 = vrot.lane.b32.xlu0 %v3164_v41, %s3261_s5 }
 0xbcc   :  { %v879_v58 = vpop.permute.xlu0 %878 }
 0xbcd   :  { %v881_v42 = vmul.f32 %v879_v58, %v864_v35 }
 0xbcf   :  { %883 = vrot.lane.b32.xlu0 %v881_v42, %s3258_s4 }
 0xc41   :  { %v884_v43 = vpop.permute.xlu0 %883 }
 0xc42   :  { %2707 = vmatmul.mubr.msk.f32.vlgmr.msra.gmra.mrb[10].mxu0 %vm229_vm5, %v884_v43 }
 0xc43   :  { %3001 = vmatpush3.bf16.msra.mxu0 %v3468_v49  ;;  %2717 = vmatprep.mubr.msk.f32.mxu0 %vm3259_vm4, %v3260_v20 }
 0xc44   :  { %3002 = vmatprep.subr.bf16.mxu0 %v3256_v13 }
 0xc47   :  { %3004 = vmatpush3.bf16.msra.mxu0 %v3482_v53 }
 0xc48   :  { %3017 = vmatprep.subr.bf16.mxu0 %v3256_v13 }
 0xc4a   :  { %2718 = vmatmul.mubr.msk.f32.vlgmr.msra.gmra.mrb[12].mxu0 %vm229_vm5, %v884_v43 }
 0xc4b   :  { %3019 = vmatpush3.bf16.msra.mxu0 %v3383_v9  ;;  %2747 = vmatprep.mubr.msk.f32.mxu0 %vm3259_vm4, %v3260_v20 }
 0xc4c   :  { %3020 = vmatprep.subr.bf16.mxu0 %v3256_v13 }
 0xc4f   :  { %3022 = vmatpush3.bf16.msra.mxu0 %v3413_v19 }
 0xc50   :  { %3023 = vmatprep.subr.bf16.mxu0 %v3256_v13 }
 0xd15   :  { %v953_v44 = vpop.f32.mrb[10].mxu0 }
 0xd16   :  { %v2708_v46 = vpop.f32.mrb[11].mxu0 }
 0xd1d   :  { %v1023_v47 = vpop.f32.mrb[12].mxu0 }
 0xd1e   :  { %v1024_v48 = vadd.f32 %v3548_v8, %v1023_v47  ;;  %v2719_v50 = vpop.f32.mrb[13].mxu0 }
 0xd20   :  { %v1027_v51 = vmax.f32 %v1024_v48, 0.0 }
 0xd22   :  { %2737 = vmatmul.mubr.msk.f32.vlgmr.msra.gmra.mrb[12].mxu1 %vm499_vm6, %v1027_v51 }
 0xd23   :  { %3031 = vmatpush3.bf16.msra.mxu1 %v3501_v61  ;;  %2777 = vmatprep.mubr.msk.f32.mxu1 %vm3259_vm4, %v3260_v20 }
 0xd24   :  { %3032 = vmatprep.subr.bf16.mxu1 %v3256_v13 }
 0xd27   :  { %3034 = vmatpush3.bf16.msra.mxu1 %v3512_v1 }
 0xd28   :  { %3035 = vmatprep.subr.bf16.mxu1 %v3256_v13 }
 0xd2b   :  { %3037 = vmatpush3.bf16.msra.mxu1 %v3528_v4 }
 0xd2c   :  { %3038 = vmatprep.subr.bf16.mxu1 %v3256_v13 }
 0xd2f   :  { %3040 = vmatpush3.bf16.msra.mxu1 %v3541_v7 }
 0xd30   :  { %3053 = vmatprep.subr.bf16.mxu1 %v3256_v13 }
 0xdf5   :  { %v1097_v52 = vpop.f32.mrb[12].mxu1 }
 0xdf6   :  { %v1098_v25 = vadd.f32 %v3565_v17, %v1097_v52  ;;  %v2738_v54 = vpop.f32.mrb[13].mxu1  ;;  %v187_v52 = vadd.f32 %v3444_v26, %v3446_v27 }
 0xdf8   :  { %v1101_v55 = vmax.f32 %v1098_v25, 0.0 }
 0xdfa   :  { %v1102_v56 = vmul.f32 %v3571_v28, %v1101_v55 }
 0xdfc   :  { %v1103_v45 = vsel %vm581_vm7, %v1102_v56, 0.0 }
 0xdfd   :  { %1104 = vadd.xlane.f32.xlu0 %v1103_v45 }
 0xe8a   :  { %v1105_v59 = vpop.xlane.xlu0 %1104 }
 0xe8b   :  { %v3658_v60 = vadd.f32 %v3575_v34, %v1105_v59 }
 0xe8d   :  { %v1107_v62 = vmax.f32 %v3658_v60, 0.0 }
 0xe8f   :  { %1115 = vperm.xlu1 %3152, %v1107_v62  }
 0xf0e   :  { %v1116_v63 = vpop.permute.xlu1 %1115 }
 0xf0f   :  { %v1118_v2 = vmul.f32 %v3435_v23, %v1116_v63 }
 0xf11   :  { %v1119_v3 = vadd.f32 %v1118_v2, %v182_v0 }
 0xf13   :  { %v1120_v5 = vadd.f32 %v1119_v3, %v953_v44 }
 0xf15   :  { %3165 = vtanh.f32 %v1120_v5 }
 0xf1f   :  { %v3166_v6 = vpop.eup %3165 }
 0xf20   :  { %1126 = vrot.lane.b32.xlu1 %v3166_v6, %s3261_s5  ;;  %v1122_v10 = vmul.f32 0.5, %v3166_v6 }
 0xf22   :  { %v1123_v11 = vadd.f32 0.5, %v1122_v10 }
 0xf24   :  { %v1124_v18 = vmul.f32 %v1123_v11, %v875_v40 }
 0xf92   :  { %v1127_v12 = vpop.permute.xlu1 %1126 }
 0xf93   :  { %v1129_v16 = vmul.f32 %v1127_v12, %v1123_v11 }
 0xf95   :  { %1131 = vrot.lane.b32.xlu1 %v1129_v16, %s3258_s4 }
0x1007   :  { %v1132_v21 = vpop.permute.xlu1 %1131 }
0x1008   :  { %v1134_v22 = vadd.f32 %v1132_v21, %v1124_v18 }
0x100a   :  { %3167 = vtanh.f32 %v1134_v22 }
0x1014   :  { %v3168_v29 = vpop.eup %3167 }
0x1015   :  { %1137 = vrot.lane.b32.xlu1 %v3168_v29, %s3261_s5 }
0x1087   :  { %v1138_v57 = vpop.permute.xlu1 %1137 }
0x1088   :  { %v1140_v30 = vmul.f32 %v1138_v57, %v1123_v11 }
0x108a   :  { %1142 = vrot.lane.b32.xlu1 %v1140_v30, %s3258_s4 }
0x10fc   :  { %v1143_v33 = vpop.permute.xlu1 %1142 }
0x10fd   :  { %2748 = vmatmul.mubr.msk.f32.vlgmr.msra.gmra.mrb[14].mxu0 %vm229_vm5, %v1143_v33 }
0x10fe   :  { %3025 = vmatpush3.bf16.msra.mxu0 %v3468_v49  ;;  %2758 = vmatprep.mubr.msk.f32.mxu0 %vm3259_vm4, %v3260_v20 }
0x10ff   :  { %3026 = vmatprep.subr.bf16.mxu0 %v3256_v13 }
0x1102   :  { %3028 = vmatpush3.bf16.msra.mxu0 %v3482_v53 }
0x1103   :  { %3041 = vmatprep.subr.bf16.mxu0 %v3256_v13 }
0x1105   :  { %2759 = vmatmul.mubr.msk.f32.vlgmr.msra.gmra.mrb[16].mxu0 %vm229_vm5, %v1143_v33 }
0x1106   :  { %3043 = vmatpush3.bf16.msra.mxu0 %v3383_v9  ;;  %2788 = vmatprep.mubr.msk.f32.mxu0 %vm3259_vm4, %v3260_v20 }
0x1107   :  { %3044 = vmatprep.subr.bf16.mxu0 %v3256_v13 }
0x110a   :  { %3046 = vmatpush3.bf16.msra.mxu0 %v3413_v19 }
0x110b   :  { %3047 = vmatprep.subr.bf16.mxu0 %v3256_v13 }
0x11d0   :  { %v1212_v35 = vpop.f32.mrb[14].mxu0 }
0x11d1   :  { %v2749_v36 = vpop.f32.mrb[15].mxu0 }
0x11d8   :  { %v1282_v37 = vpop.f32.mrb[16].mxu0 }
0x11d9   :  { %v1283_v38 = vadd.f32 %v3548_v8, %v1282_v37  ;;  %v2760_v39 = vpop.f32.mrb[17].mxu0 }
0x11db   :  { %v1286_v40 = vmax.f32 %v1283_v38, 0.0 }
0x11dd   :  { %2778 = vmatmul.mubr.msk.f32.vlgmr.msra.gmra.mrb[14].mxu1 %vm499_vm6, %v1286_v40 }
0x11de   :  { %3055 = vmatpush3.bf16.msra.mxu1 %v3501_v61  ;;  %2818 = vmatprep.mubr.msk.f32.mxu1 %vm3259_vm4, %v3260_v20 }
0x11df   :  { %3056 = vmatprep.subr.bf16.mxu1 %v3256_v13 }
0x11e2   :  { %3058 = vmatpush3.bf16.msra.mxu1 %v3512_v1 }
0x11e3   :  { %3059 = vmatprep.subr.bf16.mxu1 %v3256_v13 }
0x11e6   :  { %3061 = vmatpush3.bf16.msra.mxu1 %v3528_v4 }
0x11e7   :  { %3062 = vmatprep.subr.bf16.mxu1 %v3256_v13 }
0x11ea   :  { %3064 = vmatpush3.bf16.msra.mxu1 %v3541_v7 }
0x11eb   :  { %3077 = vmatprep.subr.bf16.mxu1 %v3256_v13 }
0x12b0   :  { %v1356_v41 = vpop.f32.mrb[14].mxu1 }
0x12b1   :  { %v1357_v58 = vadd.f32 %v3565_v17, %v1356_v41  ;;  %v2779_v42 = vpop.f32.mrb[15].mxu1 }
0x12b3   :  { %v1360_v43 = vmax.f32 %v1357_v58, 0.0  ;;  %v192_v58 = vadd.f32 %v3437_v24, %v3444_v26 }
0x12b5   :  { %v1361_v44 = vmul.f32 %v3571_v28, %v1360_v43 }
0x12b7   :  { %v1362_v46 = vsel %vm581_vm7, %v1361_v44, 0.0 }
0x12b8   :  { %1363 = vadd.xlane.f32.xlu1 %v1362_v46 }
0x1345   :  { %v1364_v47 = vpop.xlane.xlu1 %1363 }
0x1346   :  { %v3700_v48 = vadd.f32 %v3575_v34, %v1364_v47 }
0x1348   :  { %v1366_v50 = vmax.f32 %v3700_v48, 0.0 }
0x134a   :  { %1374 = vperm.xlu0 %3151, %v1366_v50  }
0x13c9   :  { %v1375_v51 = vpop.permute.xlu0 %1374 }
0x13ca   :  { %v1377_v25 = vmul.f32 %v3435_v23, %v1375_v51 }
0x13cc   :  { %v1378_v54 = vadd.f32 %v1377_v25, %v187_v52 }
0x13ce   :  { %v1379_v55 = vadd.f32 %v1378_v54, %v1212_v35 }
0x13d0   :  { %3169 = vtanh.f32 %v1379_v55 }
0x13da   :  { %v3170_v56 = vpop.eup %3169 }
0x13db   :  { %1385 = vrot.lane.b32.xlu0 %v3170_v56, %s3261_s5  ;;  %v1381_v45 = vmul.f32 0.5, %v3170_v56 }
0x13dd   :  { %v1382_v59 = vadd.f32 0.5, %v1381_v45 }
0x13df   :  { %v1383_v2 = vmul.f32 %v1382_v59, %v1134_v22 }
0x144d   :  { %v1386_v63 = vpop.permute.xlu0 %1385 }
0x144e   :  { %v1388_v0 = vmul.f32 %v1386_v63, %v1382_v59 }
0x1450   :  { %1390 = vrot.lane.b32.xlu0 %v1388_v0, %s3258_s4 }
0x14c2   :  { %v1391_v3 = vpop.permute.xlu0 %1390 }
0x14c3   :  { %v1393_v5 = vadd.f32 %v1391_v3, %v1383_v2 }
0x14c5   :  { %3171 = vtanh.f32 %v1393_v5 }
0x14cf   :  { %v3172_v6 = vpop.eup %3171 }
0x14d0   :  { %1396 = vrot.lane.b32.xlu0 %v3172_v6, %s3261_s5 }
0x1542   :  { %v1397_v27 = vpop.permute.xlu0 %1396 }
0x1543   :  { %v1399_v10 = vmul.f32 %v1397_v27, %v1382_v59 }
0x1545   :  { %1401 = vrot.lane.b32.xlu1 %v1399_v10, %s3258_s4 }
0x15b7   :  { %v1402_v11 = vpop.permute.xlu1 %1401 }
0x15b8   :  { %2789 = vmatmul.mubr.msk.f32.vlgmr.msra.gmra.mrb[18].mxu0 %vm229_vm5, %v1402_v11 }
0x15b9   :  { %3049 = vmatpush3.bf16.msra.mxu0 %v3468_v49  ;;  %2799 = vmatprep.mubr.msk.f32.mxu0 %vm3259_vm4, %v3260_v20 }
0x15ba   :  { %3050 = vmatprep.subr.bf16.mxu0 %v3256_v13 }
0x15bd   :  { %3052 = vmatpush3.bf16.msra.mxu0 %v3482_v53 }
0x15be   :  { %3065 = vmatprep.subr.bf16.mxu0 %v3256_v13 }
0x15c0   :  { %2800 = vmatmul.mubr.msk.f32.vlgmr.msra.gmra.mrb[20].mxu0 %vm229_vm5, %v1402_v11 }
0x15c1   :  { %3067 = vmatpush3.bf16.msra.mxu0 %v3383_v9  ;;  %2829 = vmatprep.mubr.msk.f32.mxu0 %vm3259_vm4, %v3260_v20 }
0x15c2   :  { %3068 = vmatprep.subr.bf16.mxu0 %v3256_v13 }
0x15c5   :  { %3070 = vmatpush3.bf16.msra.mxu0 %v3413_v19 }
0x15c6   :  { %3071 = vmatprep.subr.bf16.mxu0 %v3256_v13 }
0x168b   :  { %v1471_v12 = vpop.f32.mrb[18].mxu0 }
0x168c   :  { %v2790_v16 = vpop.f32.mrb[19].mxu0 }
0x1693   :  { %v1541_v18 = vpop.f32.mrb[20].mxu0 }
0x1694   :  { %v1542_v21 = vadd.f32 %v3548_v8, %v1541_v18  ;;  %v2801_v22 = vpop.f32.mrb[21].mxu0 }
0x1696   :  { %v1545_v29 = vmax.f32 %v1542_v21, 0.0 }
0x1698   :  { %2819 = vmatmul.mubr.msk.f32.vlgmr.msra.gmra.mrb[16].mxu1 %vm499_vm6, %v1545_v29 }
0x1699   :  { %3079 = vmatpush3.bf16.msra.mxu1 %v3501_v61  ;;  %2859 = vmatprep.mubr.msk.f32.mxu1 %vm3259_vm4, %v3260_v20 }
0x169a   :  { %3080 = vmatprep.subr.bf16.mxu1 %v3256_v13 }
0x169d   :  { %3082 = vmatpush3.bf16.msra.mxu1 %v3512_v1 }
0x169e   :  { %3083 = vmatprep.subr.bf16.mxu1 %v3256_v13 }
0x16a1   :  { %3085 = vmatpush3.bf16.msra.mxu1 %v3528_v4 }
0x16a2   :  { %3086 = vmatprep.subr.bf16.mxu1 %v3256_v13 }
0x16a5   :  { %3088 = vmatpush3.bf16.msra.mxu1 %v3541_v7 }
0x16a6   :  { %3101 = vmatprep.subr.bf16.mxu1 %v3256_v13 }
0x176b   :  { %v1615_v57 = vpop.f32.mrb[16].mxu1 }
0x176c   :  { %v1616_v30 = vadd.f32 %v3565_v17, %v1615_v57  ;;  %v2820_v33 = vpop.f32.mrb[17].mxu1  ;;  %v197_v57 = vadd.f32 %v3444_v26, %v3452_v32 }
0x176e   :  { %v1619_v35 = vmax.f32 %v1616_v30, 0.0 }
0x1770   :  { %v1620_v36 = vmul.f32 %v3571_v28, %v1619_v35 }
0x1772   :  { %v1621_v37 = vsel %vm581_vm7, %v1620_v36, 0.0 }
0x1773   :  { %1622 = vadd.xlane.f32.xlu0 %v1621_v37 }
0x1800   :  { %v1623_v38 = vpop.xlane.xlu0 %1622 }
0x1801   :  { %v3742_v39 = vadd.f32 %v3575_v34, %v1623_v38 }
0x1803   :  { %v1625_v40 = vmax.f32 %v3742_v39, 0.0 }
0x1805   :  { %1633 = vperm.xlu1 %3152, %v1625_v40  }
0x1884   :  { %v1634_v41 = vpop.permute.xlu1 %1633 }
0x1885   :  { %v1636_v42 = vmul.f32 %v3435_v23, %v1634_v41 }
0x1887   :  { %v1637_v43 = vadd.f32 %v1636_v42, %v192_v58 }
0x1889   :  { %v1638_v44 = vadd.f32 %v1637_v43, %v1471_v12 }
0x188b   :  { %3173 = vtanh.f32 %v1638_v44 }
0x1895   :  { %v3174_v46 = vpop.eup %3173 }
0x1896   :  { %1644 = vrot.lane.b32.xlu1 %v3174_v46, %s3261_s5  ;;  %v1640_v47 = vmul.f32 0.5, %v3174_v46 }
0x1898   :  { %v1641_v51 = vadd.f32 0.5, %v1640_v47 }
0x189a   :  { %v1642_v54 = vmul.f32 %v1641_v51, %v1393_v5 }
0x1908   :  { %v1645_v52 = vpop.permute.xlu1 %1644 }
0x1909   :  { %v1647_v25 = vmul.f32 %v1645_v52, %v1641_v51 }
0x190b   :  { %1649 = vrot.lane.b32.xlu1 %v1647_v25, %s3258_s4 }
0x197d   :  { %v1650_v55 = vpop.permute.xlu1 %1649 }
0x197e   :  { %v1652_v56 = vadd.f32 %v1650_v55, %v1642_v54 }
0x1980   :  { %3175 = vtanh.f32 %v1652_v56 }
0x198a   :  { %v3176_v45 = vpop.eup %3175 }
0x198b   :  { %1655 = vrot.lane.b32.xlu1 %v3176_v45, %s3261_s5 }
0x19fd   :  { %v1656_v24 = vpop.permute.xlu1 %1655 }
0x19fe   :  { %v1658_v59 = vmul.f32 %v1656_v24, %v1641_v51 }
0x1a00   :  { %1660 = vrot.lane.b32.xlu0 %v1658_v59, %s3258_s4 }
0x1a72   :  { %v1661_v63 = vpop.permute.xlu0 %1660 }
0x1a73   :  { %2830 = vmatmul.mubr.msk.f32.vlgmr.msra.gmra.mrb[22].mxu0 %vm229_vm5, %v1661_v63 }
0x1a74   :  { %3073 = vmatpush3.bf16.msra.mxu0 %v3468_v49  ;;  %2840 = vmatprep.mubr.msk.f32.mxu0 %vm3259_vm4, %v3260_v20 }
0x1a75   :  { %3074 = vmatprep.subr.bf16.mxu0 %v3256_v13 }
0x1a78   :  { %3076 = vmatpush3.bf16.msra.mxu0 %v3482_v53 }
0x1a79   :  { %3089 = vmatprep.subr.bf16.mxu0 %v3256_v13 }
0x1a7b   :  { %2841 = vmatmul.mubr.msk.f32.vlgmr.msra.gmra.mrb[24].mxu0 %vm229_vm5, %v1661_v63 }
0x1a7c   :  { %3091 = vmatpush3.bf16.msra.mxu0 %v3383_v9  ;;  %2870 = vmatprep.mubr.msk.f32.mxu0 %vm3259_vm4, %v3260_v20 }
0x1a7d   :  { %3092 = vmatprep.subr.bf16.mxu0 %v3256_v13 }
0x1a80   :  { %3094 = vmatpush3.bf16.msra.mxu0 %v3413_v19 }
0x1a81   :  { %3095 = vmatprep.subr.bf16.mxu0 %v3256_v13 }
0x1b46   :  { %v1730_v0 = vpop.f32.mrb[22].mxu0 }
0x1b47   :  { %v2831_v2 = vpop.f32.mrb[23].mxu0 }
0x1b4e   :  { %v1800_v3 = vpop.f32.mrb[24].mxu0 }
0x1b4f   :  { %v1801_v5 = vadd.f32 %v3548_v8, %v1800_v3  ;;  %v2842_v6 = vpop.f32.mrb[25].mxu0 }
0x1b51   :  { %v1804_v27 = vmax.f32 %v1801_v5, 0.0 }
0x1b53   :  { %2860 = vmatmul.mubr.msk.f32.vlgmr.msra.gmra.mrb[18].mxu1 %vm499_vm6, %v1804_v27  ;;  %v202_v27 = vadd.f32 %v3450_v31, %v3444_v26 }
0x1b54   :  { %3103 = vmatpush3.bf16.msra.mxu1 %v3501_v61  ;;  %2900 = vmatprep.mubr.msk.f32.mxu1 %vm3259_vm4, %v3260_v20 }
0x1b55   :  { %3104 = vmatprep.subr.bf16.mxu1 %v3256_v13 }
0x1b58   :  { %3106 = vmatpush3.bf16.msra.mxu1 %v3512_v1 }
0x1b59   :  { %3107 = vmatprep.subr.bf16.mxu1 %v3256_v13 }
0x1b5c   :  { %3109 = vmatpush3.bf16.msra.mxu1 %v3528_v4 }
0x1b5d   :  { %3110 = vmatprep.subr.bf16.mxu1 %v3256_v13 }
0x1b60   :  { %3112 = vmatpush3.bf16.msra.mxu1 %v3541_v7 }
0x1c26   :  { %v1874_v9 = vpop.f32.mrb[18].mxu1 }
0x1c27   :  { %v1875_v19 = vadd.f32 %v3565_v17, %v1874_v9  ;;  %v2861_v10 = vpop.f32.mrb[19].mxu1 }
0x1c29   :  { %v1878_v11 = vmax.f32 %v1875_v19, 0.0 }
0x1c2b   :  { %v1879_v12 = vmul.f32 %v3571_v28, %v1878_v11 }
0x1c2d   :  { %v1880_v16 = vsel %vm581_vm7, %v1879_v12, 0.0 }
0x1c2e   :  { %1881 = vadd.xlane.f32.xlu1 %v1880_v16 }
0x1cbb   :  { %v1882_v18 = vpop.xlane.xlu1 %1881 }
0x1cbc   :  { %v3783_v21 = vadd.f32 %v3575_v34, %v1882_v18 }
0x1cbe   :  { %v1884_v22 = vmax.f32 %v3783_v21, 0.0 }
0x1cc0   :  { %1892 = vperm.xlu0 %3151, %v1884_v22  }
0x1d3f   :  { %v1893_v29 = vpop.permute.xlu0 %1892 }
0x1d40   :  { %v1895_v30 = vmul.f32 %v3435_v23, %v1893_v29 }
0x1d42   :  { %v1896_v33 = vadd.f32 %v1895_v30, %v197_v57 }
0x1d44   :  { %v1897_v35 = vadd.f32 %v1896_v33, %v1730_v0 }
0x1d46   :  { %3177 = vtanh.f32 %v1897_v35 }
0x1d50   :  { %v3178_v36 = vpop.eup %3177 }
0x1d51   :  { %1903 = vrot.lane.b32.xlu0 %v3178_v36, %s3261_s5  ;;  %v1899_v37 = vmul.f32 0.5, %v3178_v36 }
0x1d53   :  { %v1900_v38 = vadd.f32 0.5, %v1899_v37 }
0x1d55   :  { %v1901_v42 = vmul.f32 %v1900_v38, %v1652_v56 }
0x1dc3   :  { %v1904_v41 = vpop.permute.xlu0 %1903 }
0x1dc4   :  { %v1906_v58 = vmul.f32 %v1904_v41, %v1900_v38 }
0x1dc6   :  { %1908 = vrot.lane.b32.xlu0 %v1906_v58, %s3258_s4 }
0x1e38   :  { %v1909_v43 = vpop.permute.xlu0 %1908 }
0x1e39   :  { %v1911_v44 = vadd.f32 %v1909_v43, %v1901_v42 }
0x1e3b   :  { %3179 = vtanh.f32 %v1911_v44 }
0x1e45   :  { %v3180_v46 = vpop.eup %3179 }
0x1e46   :  { %1914 = vrot.lane.b32.xlu0 %v3180_v46, %s3261_s5 }
0x1eb8   :  { %v1915_v32 = vpop.permute.xlu0 %1914 }
0x1eb9   :  { %v1917_v47 = vmul.f32 %v1915_v32, %v1900_v38 }
0x1ebb   :  { %1919 = vrot.lane.b32.xlu1 %v1917_v47, %s3258_s4 }
0x1f2d   :  { %v1920_v51 = vpop.permute.xlu1 %1919 }
0x1f2e   :  { %2871 = vmatmul.mubr.msk.f32.vlgmr.msra.gmra.mrb[26].mxu0 %vm229_vm5, %v1920_v51 }
0x1f2f   :  { %3097 = vmatpush3.bf16.msra.mxu0 %v3468_v49  ;;  %2881 = vmatprep.mubr.msk.f32.mxu0 %vm3259_vm4, %v3260_v20 }
0x1f30   :  { %3098 = vmatprep.subr.bf16.mxu0 %v3256_v13 }
0x1f33   :  { %3100 = vmatpush3.bf16.msra.mxu0 %v3482_v53 }
0x1f34   :  { %3113 = vmatprep.subr.bf16.mxu0 %v3256_v13 }
0x1f36   :  { %2882 = vmatmul.mubr.msk.f32.vlgmr.msra.gmra.mrb[28].mxu0 %vm229_vm5, %v1920_v51 }
0x1f37   :  { %3115 = vmatpush3.bf16.msra.mxu0 %v3468_v49  ;;  %2911 = vmatprep.mubr.msk.f32.mxu0 %vm3259_vm4, %v3260_v20 }
0x1f38   :  { %3116 = vmatprep.subr.bf16.mxu0 %v3256_v13 }
0x1f3b   :  { %3118 = vmatpush3.bf16.msra.mxu0 %v3482_v53 }
0x1f3c   :  { %3119 = vmatprep.subr.bf16.mxu0 %v3256_v13 }
0x2001   :  { %v1989_v52 = vpop.f32.mrb[26].mxu0 }
0x2002   :  { %v2872_v25 = vpop.f32.mrb[27].mxu0 }
0x2009   :  { %v2059_v54 = vpop.f32.mrb[28].mxu0 }
0x200a   :  { %v2060_v55 = vadd.f32 %v3548_v8, %v2059_v54  ;;  %v2883_v56 = vpop.f32.mrb[29].mxu0 }
0x200c   :  { %v2063_v45 = vmax.f32 %v2060_v55, 0.0 }
0x200e   :  { %2901 = vmatmul.mubr.msk.f32.vlgmr.msra.gmra.mrb[20].mxu1 %vm499_vm6, %v2063_v45 }
0x20e1   :  { %v2133_v24 = vpop.f32.mrb[20].mxu1 }
0x20e2   :  { %v2134_v49 = vadd.f32 %v3565_v17, %v2133_v24  ;;  %v2902_v59 = vpop.f32.mrb[21].mxu1 }
0x20e4   :  { %v2137_v63 = vmax.f32 %v2134_v49, 0.0 }
0x20e6   :  { %v2138_v0 = vmul.f32 %v3571_v28, %v2137_v63 }
0x20e8   :  { %v2139_v53 = vsel %vm581_vm7, %v2138_v0, 0.0 }
0x20e9   :  { %2140 = vadd.xlane.f32.xlu0 %v2139_v53 }
0x2176   :  { %v2141_v2 = vpop.xlane.xlu0 %2140 }
0x2177   :  { %v2142_v3 = vadd.f32 %v3575_v34, %v2141_v2 }
0x2179   :  { %v2143_v5 = vmax.f32 %v2142_v3, 0.0 }
0x217b   :  { %2151 = vperm.xlu1 %3152, %v2143_v5  }
0x21fa   :  { %v2152_v6 = vpop.permute.xlu1 %2151 }
0x21fb   :  { %v2154_v9 = vmul.f32 %v3435_v23, %v2152_v6 }
0x21fd   :  { %v2155_v19 = vadd.f32 %v2154_v9, %v202_v27 }
0x21ff   :  { %v2156_v10 = vadd.f32 %v2155_v19, %v1989_v52 }
0x2201   :  { %3181 = vtanh.f32 %v2156_v10 }
0x220b   :  { %v3182_v11 = vpop.eup %3181 }
0x220c   :  { %2162 = vrot.lane.b32.xlu1 %v3182_v11, %s3261_s5  ;;  %v2158_v12 = vmul.f32 0.5, %v3182_v11 }
0x220e   :  { %v2159_v16 = vadd.f32 0.5, %v2158_v12 }
0x2210   :  { %v2160_v57 = vmul.f32 %v2159_v16, %v1911_v44 }
0x227e   :  { %v2163_v18 = vpop.permute.xlu1 %2162 }
0x227f   :  { %v2165_v29 = vmul.f32 %v2163_v18, %v2159_v16 }
0x2281   :  { %2167 = vrot.lane.b32.xlu1 %v2165_v29, %s3258_s4 }
0x22f3   :  { %v2168_v30 = vpop.permute.xlu1 %2167 }
0x22f4   :  { %v3820_v33 = vadd.f32 %v2168_v30, %v2160_v57 }
0x22f6   :  { %3183 = vtanh.f32 %v3820_v33 }
0x2300   :  { %v3184_v26 = vpop.eup %3183 }
0x2301   :  { %2173 = vrot.lane.b32.xlu1 %v3184_v26, %s3261_s5  ;;  %s3266_s5 = smov 6  }
0x2373   :  { %v2174_v23 = vpop.permute.xlu1 %2173 }
0x2374   :  { %v2176_v31 = vmul.f32 %v2174_v23, %v2159_v16 }
0x2376   :  { %2178 = vrot.lane.b32.xlu0 %v2176_v31, %s3258_s4  ;;  %s3267_s4 = smov 5  }
0x237a   :  { %850 = vrot.lane.b32.xlu0 %v848_v15, %s3262_s11 }
0x237e   :  { %1109 = vrot.lane.b32.xlu0 %v1107_v62, %s3263_s12 }
0x2382   :  { %1368 = vrot.lane.b32.xlu0 %v1366_v50, %s3264_s0 }
0x2386   :  { %1627 = vrot.lane.b32.xlu0 %v1625_v40, %s3265_s17 }
0x238a   :  { %2145 = vrot.lane.b32.xlu0 %v2143_v5, %s3266_s5 }
0x23e8   :  { %v2179_v35 = vpop.permute.xlu0 %2178 }
0x23e9   :  { %2912 = vmatmul.mubr.msk.f32.vlgmr.msra.gmra.mrb[30].mxu0 %vm229_vm5, %v2179_v35  ;;  %2341 = vst.msk [vmem:[#allocation5] sm:$0x3] %vm2340_vm9, %v2179_v35 }
0x23ea   :  { %3121 = vmatpush3.bf16.msra.mxu0 %v3501_v61  ;;  %2930 = vmatprep.mubr.msk.f32.mxu0 %vm3259_vm4, %v3260_v20 }
0x23eb   :  { %3122 = vmatprep.subr.bf16.mxu0 %v3256_v13 }
0x23ec   :  { %v851_v14 = vpop.permute.xlu0 %850 }
0x23ed   :  { %854 = vst.msk [vmem:[#allocation3] sm:$0x3] %vm853_vm10, %v851_v14 }
0x23ee   :  { %3124 = vmatpush3.bf16.msra.mxu0 %v3512_v1 }
0x23ef   :  { %3125 = vmatprep.subr.bf16.mxu0 %v3256_v13 }
0x23f0   :  { %v1110_v15 = vpop.permute.xlu0 %1109 }
0x23f1   :  { %1113 = vst.msk [vmem:[#allocation3] sm:$0x3] %vm1112_vm11, %v1110_v15 }
0x23f2   :  { %3127 = vmatpush3.bf16.msra.mxu0 %v3528_v4 }
0x23f3   :  { %3128 = vmatprep.subr.bf16.mxu0 %v3256_v13 }
0x23f4   :  { %v1369_v61 = vpop.permute.xlu0 %1368 }
0x23f5   :  { %1372 = vst.msk [vmem:[#allocation3] sm:$0x3] %vm1371_vm12, %v1369_v61 }
0x23f6   :  { %3130 = vmatpush3.bf16.msra.mxu0 %v3541_v7 }
0x23f8   :  { %v1628_v20 = vpop.permute.xlu0 %1627 }
0x23f9   :  { %1631 = vst.msk [vmem:[#allocation3] sm:$0x3] %vm1630_vm13, %v1628_v20 }
0x24bc   :  { %v2248_v60 = vpop.f32.mrb[30].mxu0 }
0x24bd   :  { %v2249_v62 = vadd.f32 %v3548_v8, %v2248_v60  ;;  %v2913_v1 = vpop.f32.mrb[31].mxu0 }
0x24bf   :  { %v2252_v48 = vmax.f32 %v2249_v62, 0.0 }
0x24c1   :  { %2931 = vmatmul.mubr.msk.f32.vlgmr.msra.gmra.mrb[32].mxu0 %vm499_vm6, %v2252_v48 }
0x2594   :  { %v2322_v50 = vpop.f32.mrb[32].mxu0 }
0x2595   :  { %v2323_v39 = vadd.f32 %v3565_v17, %v2322_v50  ;;  %v2932_v4 = vpop.f32.mrb[33].mxu0 }
0x2597   :  { %v2326_v40 = vmax.f32 %v2323_v39, 0.0 }
0x2599   :  { %v2327_v13 = vmul.f32 %v3571_v28, %v2326_v40 }
0x259b   :  { %v2328_v36 = vsel %vm581_vm7, %v2327_v13, 0.0 }
0x259c   :  { %2329 = vadd.xlane.f32.xlu1 %v2328_v36 }
0x25ad   :  { %1886 = vrot.lane.b32.xlu1 %v1884_v22, %s3267_s4 }
0x25ae   :  { %3196 = shalt.err (!%p3193_p4)
}
0x25af   :  { %s3197_s18 = scalar_lea.hbm %s3905_s15, 32 }
0x25b0   :  { %p3198_p5 = scmp.ne.s32.totalorder %s3905_s15, %s3197_s18  ;;  %p3201_p6 = scmp.lt.u32.totalorder %s3197_s18, %s3905_s15 }
0x25b2   :  { %p3203_p7 = pnand %p3201_p6, %p3198_p5 }
0x25b4   :  { %3206 = shalt.err (!%p3203_p7)
}
0x25b5   :  { %2366 = dma.vmem_to_hbm [thread:$0]  %s2364_s29, 32, %s3905_s15, [#allocation6]   ;;  %vm1889_vm14 = vcmask 42024   ;;  %vm2148_vm15 = vcmask 50224   ;;  %v2146_v21 = vpop.permute.xlu0 %2145  ;;  %vm2337_vm0 = vcmask 58424  }
0x25b6   :  { %s3269_s23 = smov 7   ;;  %s3270_s24 = smov 96  }
0x25b7   :  { %s3271_s25 = smov [#allocation3]   ;;  %s3272_s15 = smov [#allocation7]  }
0x25b8   :  { %s2353_s26 = sshll.u32 %s3271_s25, 4  ;;  %s2373_s27 = sshll.u32 %s3272_s15, 4  ;;  %s2354_s26 = int_to_ptr.vmem [resolvable:$true] %s2353_s26  ;;  %s2374_s27 = int_to_ptr.vmem [resolvable:$true] %s2373_s27 }
0x25b9   :  { %s3207_s28 = scalar_lea.vmem %s2354_s26, 32  ;;  %p3212_p9 = scmp.lt.s32.totalorder %s2354_s26, %s2354_s26 }
0x25ba   :  { %p3208_p8 = scmp.ne.s32.totalorder %s2354_s26, %s3207_s28  ;;  %p3213_p10 = scmp.lt.s32.totalorder %s3207_s28, %s3207_s28 }
0x25bc   :  { %p3214_p11 = por %p3213_p10, %p3212_p9 }
0x25be   :  { %p3215_p12 = pnand %p3214_p11, %p3208_p8 }
0x2629   :  { %v2330_v7 = vpop.xlane.xlu1 %2329 }
0x262a   :  { %v2331_v8 = vadd.f32 %v3575_v34, %v2330_v7 }
0x262c   :  { %v2332_v17 = vmax.f32 %v2331_v8, 0.0 }
0x262d   :  { %v1887_v28 = vpop.permute.xlu1 %1886 }
0x262e   :  { %1890 = vst.msk [vmem:[#allocation3] sm:$0x3] %vm1889_vm14, %v1887_v28  ;;  %2334 = vrot.lane.b32.xlu0 %v2332_v17, %s3269_s23 }
0x262f   :  { %2149 = vst.msk [vmem:[#allocation3] sm:$0x3] %vm2148_vm15, %v2146_v21 }
0x2632   :  { %2343 = vrot.lane.b32.xlu0 %v3820_v33, %s3270_s24 }
0x26a0   :  { %v2335_v22 = vpop.permute.xlu0 %2334 }
0x26a1   :  { %2338 = vst.msk [vmem:[#allocation3] sm:$0x3] %vm2337_vm0, %v2335_v22 }
0x26a2   :  { %3218 = shalt.err (!%p3215_p12)
}
0x26a3   :  { %s3219_s13 = scalar_lea.hbm %s3904_s14, 32 }
0x26a4   :  { %p3220_p13 = scmp.ne.s32.totalorder %s3904_s14, %s3219_s13  ;;  %p3223_p0 = scmp.lt.u32.totalorder %s3219_s13, %s3904_s14 }
0x26a6   :  { %p3225_p1 = pnand %p3223_p0, %p3220_p13 }
0x26a8   :  { %3228 = shalt.err (!%p3225_p1)
}
0x26a9   :  { %2356 = dma.vmem_to_hbm [thread:$0]  %s2354_s26, 32, %s3904_s14, [#allocation4]   ;;  %v2344_v34 = vpop.permute.xlu0 %2343 }
0x26aa   :  { %2346 = vst.msk [vmem:[#allocation7] sm:$0x3] %vm2340_vm9, %v2344_v34  ;;  %s3229_s4 = scalar_lea.vmem %s2374_s27, 32  ;;  %p3234_p3 = scmp.lt.s32.totalorder %s2374_s27, %s2374_s27 }
0x26ab   :  { %p3230_p2 = scmp.ne.s32.totalorder %s2374_s27, %s3229_s4  ;;  %p3235_p4 = scmp.lt.s32.totalorder %s3229_s4, %s3229_s4 }
0x26ad   :  { %p3236_p5 = por %p3235_p4, %p3234_p3 }
0x26af   :  { %p3237_p6 = pnand %p3236_p5, %p3230_p2 }
0x26b1   :  { %3240 = shalt.err (!%p3237_p6)
}
0x26b2   :  { %s3241_s6 = scalar_lea.hbm %s3906_s16, 32 }
0x26b3   :  { %p3242_p7 = scmp.ne.s32.totalorder %s3906_s16, %s3241_s6  ;;  %p3245_p8 = scmp.lt.u32.totalorder %s3241_s6, %s3906_s16 }
0x26b5   :  { %p3247_p9 = pnand %p3245_p8, %p3242_p7 }
0x26b7   :  { %3250 = shalt.err (!%p3247_p9)
}
0x26b8   :  { %2376 = dma.vmem_to_hbm [thread:$0]  %s2374_s27, 32, %s3906_s16, [#allocation6]  }
0x26b9   :  { %3251 = dma.done.wait [#allocation4], 32  }
0x26ba   :  { %3252 = vsyncadd [#allocation4], 4294967264 }
0x26bb   :  { %3253 = dma.done.wait [#allocation6], 64  }
0x26bc   :  { %3254 = vsyncadd [#allocation6], 4294967232 }
0x26bd   :  { %2386 = vsyncpa [#allocation4], 1 }
0x26be   :  { %2387 = vsyncpa [#allocation6], 1 }

</bundles_post_ra>
